<compile_context>
chip_gen: v5e
topology: v5e:2x2
jax: 0.10.0
libtpu: 0.0.40
codegen_flags: <defaults>
</compile_context>

<pallas_src>
import functools

import jax
import jax.numpy as jnp
from jax import lax
from jax.experimental import pallas as pl
from jax.experimental.pallas import tpu as pltpu


def _attn_kernel(tok_ref, w_ref, b_ref, out_ref, coarse_ref):
    """tok_ref: (Gb, S, HD) bf16; w_ref: (HD, 3*HD) bf16; b_ref: (1, 3*HD) f32.

    out_ref:    (Gb, S, HD) f32  -- softmax(k q^T) @ v
    coarse_ref: (Gb, 1, S)  f32  -- sum over dim=-2 of softmax(k q^T)
    """
    Gb, S, HD = tok_ref.shape

    # Fused QKV projection: one MXU pass on a (Gb*S, HD) LHS, f32 accumulation.
    t2d = tok_ref[...].reshape(Gb * S, HD)
    qkv = jnp.dot(t2d, w_ref[...], preferred_element_type=jnp.float32)
    qkv = (qkv + b_ref[...]).reshape(Gb, S, 3 * HD)                       # f32
    q = qkv[..., :HD].astype(jnp.bfloat16)
    k = qkv[..., HD:2 * HD].astype(jnp.bfloat16)
    v = qkv[..., 2 * HD:].astype(jnp.bfloat16)

    # scores = k @ q^T (torch order), contracted on the last dims (no transpose).
    s = jnp.einsum('gsd,gtd->gst', k, q, preferred_element_type=jnp.float32)

    # softmax(dim=-1) in f32; no 1/sqrt(d) scaling (faithful to the module).
    s = s - jnp.max(s, axis=-1, keepdims=True)
    e = jnp.exp(s)
    p = e * pl.reciprocal(jnp.sum(e, axis=-1, keepdims=True), approx=True)

    # coarse_attn = sum over dim=-2 of the softmax probabilities.
    coarse_ref[...] = jnp.sum(p, axis=1, keepdims=True).astype(coarse_ref.dtype)

    out = jnp.einsum('gst,gtd->gsd', p.astype(jnp.bfloat16), v,
                     preferred_element_type=jnp.float32)
    out_ref[...] = out.astype(out_ref.dtype)


def _attention_tokens(tokens, w_fused, b_fused, group_block=16):
    """tokens: (G, S, HD) f32. w_fused: (HD, 3*HD). b_fused: (3*HD,).

    Returns (out, coarse): out (G, S, HD) f32, coarse (G, S) f32.
    """
    G, S, HD = tokens.shape
    Gb = min(group_block, G)
    G_pad = pl.cdiv(G, Gb) * Gb
    if G_pad != G:
        tokens = jnp.pad(tokens, ((0, G_pad - G), (0, 0), (0, 0)))

    tokens_bf16 = tokens.astype(jnp.bfloat16)
    w_bf16 = w_fused.astype(jnp.bfloat16)
    b = b_fused.reshape(1, 3 * HD).astype(jnp.float32)

    out, coarse = pl.pallas_call(
        _attn_kernel,
        out_shape=(
            jax.ShapeDtypeStruct((G_pad, S, HD), jnp.float32),
            jax.ShapeDtypeStruct((G_pad, 1, S), jnp.float32),
        ),
        grid=(G_pad // Gb,),
        in_specs=[
            pl.BlockSpec((Gb, S, HD), lambda g: (g, 0, 0)),
            pl.BlockSpec((HD, 3 * HD), lambda g: (0, 0)),
            pl.BlockSpec((1, 3 * HD), lambda g: (0, 0)),
        ],
        out_specs=(
            pl.BlockSpec((Gb, S, HD), lambda g: (g, 0, 0)),
            pl.BlockSpec((Gb, 1, S), lambda g: (g, 0, 0)),
        ),
        compiler_params=pltpu.CompilerParams(
            dimension_semantics=("parallel",),
        ),
    )(tokens_bf16, w_bf16, b)

    return out[:G], coarse[:G].reshape(G, S)


def coarse_self_attention(x, params, head_dim):
    """x: (B, dim, H, W) f32 (NCHW). Returns (top_k, output) like the torch module."""
    # ---- Downsample: Conv2d(dim, dim, kernel=4, stride=2, padding=1) -------------
    # TODO(synk): downsample/upsample convolutions and top-k stay in plain JAX (XLA);
    # only the attention core runs in Pallas.
    x = lax.conv_general_dilated(
        x, params['w_down'], window_strides=(2, 2), padding=((1, 1), (1, 1)),
        dimension_numbers=('NCHW', 'OIHW', 'NCHW'))
    x = x + params['b_down'][None, :, None, None]

    B, C, h, w = x.shape
    NH = C // head_dim
    S = h * w

    # view(B, NH, HD, -1).transpose(-2, -1) -> tokens (B, NH, S, HD)
    tokens = x.reshape(B, NH, head_dim, S)
    tokens = jnp.transpose(tokens, (0, 1, 3, 2)).reshape(B * NH, S, head_dim)

    out, coarse = _attention_tokens(tokens, params['w_qkv_fused'], params['b_qkv'])

    # top-k over coarse attention scores
    k_features = (h * w) // 4
    coarse = coarse.reshape(B, NH, S)
    _, top_k = lax.top_k(coarse, k_features)                     # (B, NH, k_features)

    # output.permute(0,1,3,2).reshape(B, C, h, w)
    out = out.reshape(B, NH, S, head_dim)
    out = jnp.transpose(out, (0, 1, 3, 2)).reshape(B, C, h, w)

    # ---- Upsample: ConvTranspose2d(dim, dim, kernel=4, stride=2, padding=1) ------
    # equivalent dilated conv with spatially-flipped, (in,out)->(out,in) kernel.
    w_t = jnp.transpose(jnp.flip(params['w_up'], (2, 3)), (1, 0, 2, 3))
    out = lax.conv_general_dilated(
        out, w_t, window_strides=(1, 1), padding=((2, 2), (2, 2)),
        lhs_dilation=(2, 2), dimension_numbers=('NCHW', 'OIHW', 'NCHW'))
    out = out + params['b_up'][None, :, None, None]

    return top_k, out


def init_params(key, dim, head_dim):
    k1, k2, k3, k4, k5, k6 = jax.random.split(key, 6)
    p = {}
    # Downsample Conv2d weights: (out, in, kH, kW)
    p['w_down'] = jax.random.normal(k1, (dim, dim, 4, 4), jnp.float32) * 0.02
    p['b_down'] = jax.random.normal(k2, (dim,), jnp.float32) * 0.02
    # Upsample ConvTranspose2d weights: torch layout (in, out, kH, kW)
    p['w_up'] = jax.random.normal(k3, (dim, dim, 4, 4), jnp.float32) * 0.02
    p['b_up'] = jax.random.normal(k4, (dim,), jnp.float32) * 0.02
    # nn.Linear(head_dim, 3*head_dim): torch weight (3*HD, HD), bias (3*HD,)
    w_qkv = jax.random.normal(k5, (3 * head_dim, head_dim), jnp.float32) * 0.05
    p['w_qkv_fused'] = w_qkv.T                                     # (HD, 3*HD); y = x @ W^T + b
    p['b_qkv'] = jax.random.normal(k6, (3 * head_dim,), jnp.float32) * 0.05
    return p


if __name__ == "__main__":
    key = jax.random.PRNGKey(0)
    B = 2
    head_dim = 64
    NH = 2
    dim = NH * head_dim          # 128 channels
    H = W = 16                   # downsample -> 8x8 -> S = 64 tokens per head

    kx, kp = jax.random.split(key)
    x = jax.random.normal(kx, (B, dim, H, W), dtype=jnp.float32)
    params = init_params(kp, dim, head_dim)

    fwd = jax.jit(functools.partial(coarse_self_attention, head_dim=head_dim))
    top_k, out = fwd(x, params)
    top_k, out = jax.block_until_ready((top_k, out))

    h, w = H // 2, W // 2
    assert top_k.shape == (B, NH, (h * w) // 4), top_k.shape
    assert out.shape == (B, dim, H, W), out.shape
    print("KERNEL_OK")
</pallas_src>

<mosaic_0001>
module attributes {stable_mosaic.version = 11 : i64} {
  func.func @_attn_kernel(%arg0: i32, %arg1: memref<4x64x64xbf16, #tpu.memory_space<vmem>>, %arg2: memref<64x192xbf16, #tpu.memory_space<vmem>>, %arg3: memref<1x192xf32, #tpu.memory_space<vmem>>, %arg4: memref<4x64x64xf32, #tpu.memory_space<vmem>>, %arg5: memref<4x1x64xf32, #tpu.memory_space<vmem>>) attributes {dimension_semantics = [#tpu.dimension_semantics<parallel>], iteration_bounds = array<i64: 1>, scalar_prefetch = 0 : i64, scratch_operands = 0 : i64, tpu.core_type = #tpu.core_type<tc>, window_params = [{transform_indices = @transform_0, window_bounds = array<i64: 4, 64, 64>}, {pipeline_mode = #tpu.pipeline_mode<synchronous>, transform_indices = @transform_1, window_bounds = array<i64: 64, 192>}, {pipeline_mode = #tpu.pipeline_mode<synchronous>, transform_indices = @transform_2, window_bounds = array<i64: 1, 192>}, {transform_indices = @transform_3, window_bounds = array<i64: 4, 64, 64>}, {transform_indices = @transform_4, window_bounds = array<i64: 4, 1, 64>}]} {
    %c0 = arith.constant 0 : index
    %c0_0 = arith.constant 0 : index
    %c0_1 = arith.constant 0 : index
    %0 = vector.load %arg1[%c0, %c0_0, %c0_1] : memref<4x64x64xbf16, #tpu.memory_space<vmem>>, vector<4x64x64xbf16>
    %1 = vector.shape_cast %0 : vector<4x64x64xbf16> to vector<256x64xbf16>
    %c0_2 = arith.constant 0 : index
    %c0_3 = arith.constant 0 : index
    %2 = vector.load %arg2[%c0_2, %c0_3] : memref<64x192xbf16, #tpu.memory_space<vmem>>, vector<64x192xbf16>
    %cst = arith.constant dense<0.000000e+00> : vector<256x192xf32>
    %3 = tpu.matmul %1, %2, %cst {dimension_numbers = #tpu.dot_dimension_numbers<[1], [0], [0], [1], [0, 0, 1, 1], [], []>} : vector<256x64xbf16>, vector<64x192xbf16>, vector<256x192xf32> -> vector<256x192xf32>
    %c0_4 = arith.constant 0 : index
    %c0_5 = arith.constant 0 : index
    %4 = vector.load %arg3[%c0_4, %c0_5] : memref<1x192xf32, #tpu.memory_space<vmem>>, vector<1x192xf32>
    %5 = vector.broadcast %4 : vector<1x192xf32> to vector<256x192xf32>
    %6 = arith.addf %3, %5 : vector<256x192xf32>
    %7 = vector.shape_cast %6 : vector<256x192xf32> to vector<4x64x192xf32>
    %8 = vector.extract_strided_slice %7 {offsets = [0, 0, 0], sizes = [4, 64, 64], strides = [1, 1, 1]} : vector<4x64x192xf32> to vector<4x64x64xf32>
    %9 = arith.truncf %8 : vector<4x64x64xf32> to vector<4x64x64xbf16>
    %10 = vector.extract_strided_slice %7 {offsets = [0, 0, 64], sizes = [4, 64, 64], strides = [1, 1, 1]} : vector<4x64x192xf32> to vector<4x64x64xf32>
    %11 = arith.truncf %10 : vector<4x64x64xf32> to vector<4x64x64xbf16>
    %12 = vector.extract_strided_slice %7 {offsets = [0, 0, 128], sizes = [4, 64, 64], strides = [1, 1, 1]} : vector<4x64x192xf32> to vector<4x64x64xf32>
    %13 = arith.truncf %12 : vector<4x64x64xf32> to vector<4x64x64xbf16>
    "tpu.trace_start"() <{level = 10 : i32, message = "gsd,gtd->gst"}> : () -> ()
    %cst_6 = arith.constant dense<0.000000e+00> : vector<4x64x64xf32>
    %14 = tpu.matmul %11, %9, %cst_6 {dimension_numbers = #tpu.dot_dimension_numbers<[2], [2], [1], [1], [0, 0, 0, 1, 1, 1], [0], [0]>} : vector<4x64x64xbf16>, vector<4x64x64xbf16>, vector<4x64x64xf32> -> vector<4x64x64xf32>
    "tpu.trace_stop"() : () -> ()
    %cst_7 = arith.constant dense<0xFF800000> : vector<4x64xf32>
    %15 = vector.multi_reduction <maximumf>, %14, %cst_7 [2] : vector<4x64x64xf32> to vector<4x64xf32>
    %16 = vector.shape_cast %15 : vector<4x64xf32> to vector<4x64x1xf32>
    %17 = vector.broadcast %16 : vector<4x64x1xf32> to vector<4x64x64xf32>
    %18 = arith.subf %14, %17 : vector<4x64x64xf32>
    %19 = math.exp %18 : vector<4x64x64xf32>
    %cst_8 = arith.constant dense<0.000000e+00> : vector<4x64xf32>
    %20 = vector.multi_reduction <add>, %19, %cst_8 [2] : vector<4x64x64xf32> to vector<4x64xf32>
    %21 = vector.shape_cast %20 : vector<4x64xf32> to vector<4x64x1xf32>
    %22 = tpu.reciprocal %21 {approx = true} : vector<4x64x1xf32> -> vector<4x64x1xf32>
    %23 = vector.broadcast %22 : vector<4x64x1xf32> to vector<4x64x64xf32>
    %24 = arith.mulf %19, %23 : vector<4x64x64xf32>
    %cst_9 = arith.constant dense<0.000000e+00> : vector<4x64xf32>
    %25 = vector.multi_reduction <add>, %24, %cst_9 [1] : vector<4x64x64xf32> to vector<4x64xf32>
    %26 = vector.shape_cast %25 : vector<4x64xf32> to vector<4x1x64xf32>
    %c0_10 = arith.constant 0 : index
    %c0_11 = arith.constant 0 : index
    %c0_12 = arith.constant 0 : index
    %27 = vector.load %arg5[%c0_10, %c0_11, %c0_12] : memref<4x1x64xf32, #tpu.memory_space<vmem>>, vector<4x1x64xf32>
    tpu.vector_store %arg5[%c0_10, %c0_11, %c0_12], %26 {strides = array<i32>} : memref<4x1x64xf32, #tpu.memory_space<vmem>>, vector<4x1x64xf32>,
    %28 = arith.truncf %24 : vector<4x64x64xf32> to vector<4x64x64xbf16>
    "tpu.trace_start"() <{level = 10 : i32, message = "gst,gtd->gsd"}> : () -> ()
    %cst_13 = arith.constant dense<0.000000e+00> : vector<4x64x64xf32>
    %29 = tpu.matmul %28, %13, %cst_13 {dimension_numbers = #tpu.dot_dimension_numbers<[2], [1], [1], [2], [0, 0, 0, 1, 1, 2], [0], [0]>} : vector<4x64x64xbf16>, vector<4x64x64xbf16>, vector<4x64x64xf32> -> vector<4x64x64xf32>
    "tpu.trace_stop"() : () -> ()
    %c0_14 = arith.constant 0 : index
    %c0_15 = arith.constant 0 : index
    %c0_16 = arith.constant 0 : index
    %30 = vector.load %arg4[%c0_14, %c0_15, %c0_16] : memref<4x64x64xf32, #tpu.memory_space<vmem>>, vector<4x64x64xf32>
    tpu.vector_store %arg4[%c0_14, %c0_15, %c0_16], %29 {strides = array<i32>} : memref<4x64x64xf32, #tpu.memory_space<vmem>>, vector<4x64x64xf32>,
    return
  }
  func.func @transform_0(%arg0: i32) -> (i32, i32, i32) {
    %c0_i32 = arith.constant 0 : i32
    %c0_i32_0 = arith.constant 0 : i32
    %c0_i32_1 = arith.constant 0 : i32
    return %arg0, %c0_i32, %c0_i32_0 : i32, i32, i32
  }
  func.func @transform_1(%arg0: i32) -> (i32, i32) {
    %c0_i32 = arith.constant 0 : i32
    %c0_i32_0 = arith.constant 0 : i32
    %c0_i32_1 = arith.constant 0 : i32
    return %c0_i32, %c0_i32_0 : i32, i32
  }
  func.func @transform_2(%arg0: i32) -> (i32, i32) {
    %c0_i32 = arith.constant 0 : i32
    %c0_i32_0 = arith.constant 0 : i32
    %c0_i32_1 = arith.constant 0 : i32
    return %c0_i32, %c0_i32_0 : i32, i32
  }
  func.func @transform_3(%arg0: i32) -> (i32, i32, i32) {
    %c0_i32 = arith.constant 0 : i32
    %c0_i32_0 = arith.constant 0 : i32
    %c0_i32_1 = arith.constant 0 : i32
    return %arg0, %c0_i32, %c0_i32_0 : i32, i32, i32
  }
  func.func @transform_4(%arg0: i32) -> (i32, i32, i32) {
    %c0_i32 = arith.constant 0 : i32
    %c0_i32_0 = arith.constant 0 : i32
    %c0_i32_1 = arith.constant 0 : i32
    return %arg0, %c0_i32, %c0_i32_0 : i32, i32, i32
  }
}

</mosaic_0001>

<bundles_post_ra>
// kernel: coarse_self_attention.1
= control target key start
LH: loop header
LB: loop body
LE: loop exit
PB: predicated region body
PF: predicated region fallthrough
CT: control target
= control target key end

     0   :  { %vm183_vm0 = vcmask 523264   ;;  %s1964_s26 = smov 64   ;;  %vm1234_vm1 = vcmask 516096   ;;  %s2919_s1 = inlined_call_operand.vmem [shape: bf16[64,192], index: 1, kind: input, shape index: {}]   ;;  %s2920_s0 = inlined_call_operand.vmem [shape: bf16[4,64,64], index: 0, kind: input, shape index: {}]   ;;  %s2921_s2 = inlined_call_operand.vmem [shape: f32[1,192], index: 2, kind: input, shape index: {}]   ;;  %s2922_s4 = inlined_call_operand.vmem [shape: f32[4,1,64], index: 4, kind: output, shape index: {1}]   ;;  %s2923_s3 = inlined_call_operand.vmem [shape: f32[4,64,64], index: 3, kind: output, shape index: {0}]  }
   0x1   :  { %v1741_v0 = vld [vmem:[%s2919_s1 + $0x30] sm:$0xf]  ;;  %v1834_v1 = vld [vmem:[%s2919_s1 + $0x34] sm:$0xf0]  ;;  %v1733_v2 = vld [vmem:[%s2919_s1 + $0x20] sm:$0xf] }
   0x2   :  { %v1742_v3 = vor.u32 %v1834_v1, %v1741_v0  ;;  %v1832_v4 = vld [vmem:[%s2919_s1 + $0x24] sm:$0xf0]  ;;  %v1725_v6 = vld [vmem:[%s2919_s1 + $0x10] sm:$0xf]  ;;  %v1830_v7 = vld [vmem:[%s2919_s1 + $0x14] sm:$0xf0] }
   0x3   :  { %v1734_v5 = vor.u32 %v1832_v4, %v1733_v2  ;;  %v1726_v8 = vor.u32 %v1830_v7, %v1725_v6  ;;  %v1717_v9 = vld [vmem:[%s2919_s1] sm:$0xf]  ;;  %v1828_v10 = vld [vmem:[%s2919_s1 + $0x4] sm:$0xf0]  ;;  %v2031_v14 = vld [vmem:[%s2920_s0 + $0x10] sm:$0xff] }
   0x4   :  { %236 = vmatpush.bf16.msra.mxu0 %v1742_v3  ;;  %v1718_v11 = vor.u32 %v1828_v10, %v1717_v9  ;;  %v2017_v12 = vld [vmem:[%s2920_s0] sm:$0xff]  ;;  %v2024_v13 = vld [vmem:[%s2920_s0 + $0x8] sm:$0xff]  ;;  %v2038_v15 = vld [vmem:[%s2920_s0 + $0x18] sm:$0xff] }
   0x5   :  { %v2045_v16 = vld [vmem:[%s2920_s0 + $0x20] sm:$0xff]  ;;  %v2052_v17 = vld [vmem:[%s2920_s0 + $0x28] sm:$0xff]  ;;  %v2059_v18 = vld [vmem:[%s2920_s0 + $0x30] sm:$0xff] }
   0x6   :  { %v2066_v19 = vld [vmem:[%s2920_s0 + $0x38] sm:$0xff]  ;;  %v2073_v20 = vld [vmem:[%s2921_s2] sm:$0x3]  ;;  %v2092_v32 = vld [vmem:[%s2920_s0 + $0x48] sm:$0xff] }
   0x7   :  { %v2078_v21 = vld [vmem:[%s2920_s0 + $0x40] sm:$0xff]  ;;  %v2081_v23 = vperm.slane %v2073_v20, 0  ;;  %v2103_v42 = vld [vmem:[%s2920_s0 + $0x50] sm:$0xff]  ;;  %v2113_v52 = vld [vmem:[%s2920_s0 + $0x58] sm:$0xff] }
   0x8   :  { %237 = vmatpush.bf16.msra.mxu0 %v1734_v5  ;;  %v2123_v62 = vld [vmem:[%s2920_s0 + $0x60] sm:$0xff]  ;;  %v2136_v10 = vld [vmem:[%s2920_s0 + $0x68] sm:$0xff] }
   0xc   :  { %238 = vmatpush.bf16.msra.mxu0 %v1726_v8 }
  0x10   :  { %239 = vmatpush.bf16.msra.mxu0 %v1718_v11 }
  0x13   :  { %1747 = vmatmul.msk.bf16.vlgmr.msra.gmra.mxu0 %vm183_vm0, %v2017_v12 }
  0x23   :  { %1748 = vmatmul.msk.bf16.gmra.mxu0 %vm183_vm0, %v2024_v13 }
  0x33   :  { %1749 = vmatmul.msk.bf16.gmra.mxu0 %vm183_vm0, %v2031_v14 }
  0x43   :  { %1750 = vmatmul.msk.bf16.gmra.mxu0 %vm183_vm0, %v2038_v15 }
  0x53   :  { %1751 = vmatmul.msk.bf16.gmra.mxu0 %vm183_vm0, %v2045_v16 }
  0x63   :  { %1752 = vmatmul.msk.bf16.gmra.mxu0 %vm183_vm0, %v2052_v17 }
  0x73   :  { %1753 = vmatmul.msk.bf16.gmra.mxu0 %vm183_vm0, %v2059_v18 }
  0x83   :  { %1754 = vmatmul.msk.bf16.gmra.mxu0 %vm183_vm0, %v2066_v19 }
  0x90   :  { %v241_v22 = vpop.f32.mrf.mxu0 }
  0x91   :  { %v242_v24 = vadd.f32 %v241_v22, %v2081_v23 }
  0x93   :  { %1755 = vmatmul.msk.bf16.gmra.mxu0 %vm183_vm0, %v2078_v21  ;;  %v410_v26 = vpack.c.bf16 %v242_v24, %v242_v24 }
  0x95   :  { %v482_v29 = vunpack.c.l.b16 %v410_v26 }
  0x98   :  { %v243_v25 = vpop.f32.mrf.mxu0 }
  0x99   :  { %v244_v27 = vadd.f32 %v243_v25, %v2081_v23 }
  0x9b   :  { %v411_v28 = vpack.c.bf16 %v244_v27, %v244_v27 }
  0x9d   :  { %v483_v30 = vunpack.c.l.b16 %v411_v28 }
  0x9f   :  { %v2087_v31 = vpack.c.b16 %v483_v30, %v482_v29 }
  0xa0   :  { %v246_v33 = vpop.f32.mrf.mxu0 }
  0xa1   :  { %494 = vrot.lane.b32.xlu0 %v2087_v31, %s1964_s26  ;;  %v247_v34 = vadd.f32 %v246_v33, %v2081_v23  ;;  %v515_v28 = vsel %vm183_vm0, %v2087_v31, 0 }
  0xa3   :  { %1756 = vmatmul.msk.bf16.gmra.mxu0 %vm183_vm0, %v2092_v32  ;;  %v412_v36 = vpack.c.bf16 %v247_v34, %v247_v34 }
  0xa5   :  { %v484_v39 = vunpack.c.l.b16 %v412_v36 }
  0xa8   :  { %v248_v35 = vpop.f32.mrf.mxu0 }
  0xa9   :  { %v249_v37 = vadd.f32 %v248_v35, %v2081_v23  ;;  %v2151_v35 = vld [vmem:[%s2920_s0 + $0x70] sm:$0xff] }
  0xab   :  { %v413_v38 = vpack.c.bf16 %v249_v37, %v249_v37 }
  0xad   :  { %v485_v40 = vunpack.c.l.b16 %v413_v38 }
  0xaf   :  { %v491_v41 = vpack.c.b16 %v485_v40, %v484_v39 }
  0xb0   :  { %v251_v43 = vpop.f32.mrf.mxu0 }
  0xb1   :  { %496 = vrot.lane.b32.xlu1 %v491_v41, %s1964_s26  ;;  %v252_v44 = vadd.f32 %v251_v43, %v2081_v23  ;;  %v518_v22 = vsel %vm183_vm0, %v491_v41, 0 }
  0xb3   :  { %1757 = vmatmul.msk.bf16.gmra.mxu0 %vm183_vm0, %v2103_v42  ;;  %v414_v46 = vpack.c.bf16 %v252_v44, %v252_v44 }
  0xb5   :  { %v486_v49 = vunpack.c.l.b16 %v414_v46 }
  0xb8   :  { %v253_v45 = vpop.f32.mrf.mxu0 }
  0xb9   :  { %v254_v47 = vadd.f32 %v253_v45, %v2081_v23  ;;  %v2161_v45 = vld [vmem:[%s2920_s0 + $0x78] sm:$0xff] }
  0xbb   :  { %v415_v48 = vpack.c.bf16 %v254_v47, %v254_v47 }
  0xbd   :  { %v487_v50 = vunpack.c.l.b16 %v415_v48 }
  0xbf   :  { %v492_v51 = vpack.c.b16 %v487_v50, %v486_v49 }
  0xc0   :  { %v256_v53 = vpop.f32.mrf.mxu0 }
  0xc1   :  { %498 = vrot.lane.b32.xlu2 %v492_v51, %s1964_s26  ;;  %v257_v54 = vadd.f32 %v256_v53, %v2081_v23  ;;  %v521_v5 = vsel %vm183_vm0, %v492_v51, 0 }
  0xc3   :  { %1758 = vmatmul.msk.bf16.gmra.mxu0 %vm183_vm0, %v2113_v52  ;;  %v416_v56 = vpack.c.bf16 %v257_v54, %v257_v54 }
  0xc5   :  { %v488_v59 = vunpack.c.l.b16 %v416_v56 }
  0xc8   :  { %v258_v55 = vpop.f32.mrf.mxu0 }
  0xc9   :  { %v259_v57 = vadd.f32 %v258_v55, %v2081_v23 }
  0xcb   :  { %v417_v58 = vpack.c.bf16 %v259_v57, %v259_v57 }
  0xcd   :  { %v489_v60 = vunpack.c.l.b16 %v417_v58 }
  0xcf   :  { %v493_v61 = vpack.c.b16 %v489_v60, %v488_v59 }
  0xd0   :  { %v261_v63 = vpop.f32.mrf.mxu0 }
  0xd1   :  { %v524_v0 = vsel %vm183_vm0, %v493_v61, 0  ;;  %v262_v1 = vadd.f32 %v261_v63, %v2081_v23 }
  0xd2   :  { %530 = vmatpush.bf16.xpose.msra.mxu2 %v524_v0 }
  0xd3   :  { %1759 = vmatmul.msk.bf16.gmra.mxu0 %vm183_vm0, %v2123_v62  ;;  %v418_v3 = vpack.c.bf16 %v262_v1, %v262_v1 }
  0xd5   :  { %v563_v7 = vunpack.c.l.b16 %v418_v3 }
  0xd8   :  { %v263_v2 = vpop.f32.mrf.mxu0 }
  0xd9   :  { %v264_v4 = vadd.f32 %v263_v2, %v2081_v23 }
  0xda   :  { %531 = vmatpush.bf16.xpose.msra.mxu2 %v521_v5 }
  0xdb   :  { %v419_v6 = vpack.c.bf16 %v264_v4, %v264_v4 }
  0xdd   :  { %v564_v8 = vunpack.c.l.b16 %v419_v6 }
  0xdf   :  { %v2131_v9 = vpack.c.b16 %v564_v8, %v563_v7 }
  0xe0   :  { %v266_v11 = vpop.f32.mrf.mxu0 }
  0xe1   :  { %575 = vrot.lane.b32.xlu0 %v2131_v9, %s1964_s26  ;;  %v267_v24 = vadd.f32 %v266_v11, %v2081_v23 }
  0xe2   :  { %532 = vmatpush.bf16.xpose.msra.mxu2 %v518_v22 }
  0xe3   :  { %1760 = vmatmul.msk.bf16.gmra.mxu0 %vm183_vm0, %v2136_v10  ;;  %v420_v25 = vpack.c.bf16 %v267_v24, %v267_v24 }
  0xe5   :  { %v565_v29 = vunpack.c.l.b16 %v420_v25  ;;  %v596_v25 = vsel %vm183_vm0, %v2131_v9, 0  ;;  %v1743_v9 = vld [vmem:[%s2919_s1 + $0x38] sm:$0xf0] }
  0xe8   :  { %v268_v26 = vpop.f32.mrf.mxu0 }
  0xe9   :  { %v269_v27 = vadd.f32 %v268_v26, %v2081_v23  ;;  %500 = vrot.lane.b32.xlu0 %v493_v61, %s1964_s26 }
  0xea   :  { %533 = vmatpush.bf16.xpose.msra.mxu2 %v515_v28 }
  0xeb   :  { %v421_v30 = vpack.c.bf16 %v269_v27, %v269_v27 }
  0xed   :  { %v566_v33 = vunpack.c.l.b16 %v421_v30 }
  0xef   :  { %v572_v34 = vpack.c.b16 %v566_v33, %v565_v29 }
  0xf0   :  { %v271_v36 = vpop.f32.mrf.mxu0 }
  0xf1   :  { %577 = vrot.lane.b32.xlu1 %v572_v34, %s1964_s26  ;;  %v272_v37 = vadd.f32 %v271_v36, %v2081_v23  ;;  %v599_v6 = vsel %vm183_vm0, %v572_v34, 0 }
  0xf3   :  { %1761 = vmatmul.msk.bf16.gmra.mxu0 %vm183_vm0, %v2151_v35  ;;  %v422_v38 = vpack.c.bf16 %v272_v37, %v272_v37 }
  0xf5   :  { %v567_v40 = vunpack.c.l.b16 %v422_v38  ;;  %v1833_v38 = vld [vmem:[%s2919_s1 + $0x34] sm:$0xf] }
  0xf8   :  { %v273_v31 = vpop.f32.mrf.mxu0 }
  0xf9   :  { %v274_v39 = vadd.f32 %v273_v31, %v2081_v23  ;;  %v1831_v31 = vld [vmem:[%s2919_s1 + $0x24] sm:$0xf] }
  0xfb   :  { %v423_v41 = vpack.c.bf16 %v274_v39, %v274_v39  ;;  %v1746_v39 = vor.u32 %v1833_v38, %v1743_v9 }
  0xfd   :  { %v568_v43 = vunpack.c.l.b16 %v423_v41  ;;  %325 = vmatpush.bf16.msra.mxu1 %v1746_v39 }
  0xff   :  { %v573_v44 = vpack.c.b16 %v568_v43, %v567_v40  ;;  %v1735_v40 = vld [vmem:[%s2919_s1 + $0x28] sm:$0xf0] }
 0x100   :  { %v276_v46 = vpop.f32.mrf.mxu0 }
 0x101   :  { %579 = vrot.lane.b32.xlu2 %v573_v44, %s1964_s26  ;;  %v277_v47 = vadd.f32 %v276_v46, %v2081_v23  ;;  %v602_v0 = vsel %vm183_vm0, %v573_v44, 0  ;;  %v1738_v44 = vor.u32 %v1831_v31, %v1735_v40 }
 0x103   :  { %1762 = vmatmul.msk.bf16.gmra.mxu0 %vm183_vm0, %v2161_v45  ;;  %v424_v48 = vpack.c.bf16 %v277_v47, %v277_v47  ;;  %326 = vmatpush.bf16.msra.mxu1 %v1738_v44 }
 0x105   :  { %v569_v51 = vunpack.c.l.b16 %v424_v48 }
 0x108   :  { %v278_v49 = vpop.f32.mrf.mxu0 }
 0x109   :  { %v279_v50 = vadd.f32 %v278_v49, %v2081_v23 }
 0x10b   :  { %v425_v53 = vpack.c.bf16 %v279_v50, %v279_v50 }
 0x10d   :  { %v570_v54 = vunpack.c.l.b16 %v425_v53 }
 0x10f   :  { %v574_v55 = vpack.c.b16 %v570_v54, %v569_v51 }
 0x110   :  { %v281_v56 = vpop.f32.mrf.mxu0 }
 0x111   :  { %581 = vrot.lane.b32.xlu1 %v574_v55, %s1964_s26  ;;  %v605_v57 = vsel %vm183_vm0, %v574_v55, 0  ;;  %v282_v58 = vadd.f32 %v281_v56, %v2081_v23  ;;  %v1829_v56 = vld [vmem:[%s2919_s1 + $0x14] sm:$0xf] }
 0x112   :  { %611 = vmatpush.bf16.xpose.msra.mxu3 %v605_v57  ;;  %v1727_v57 = vld [vmem:[%s2919_s1 + $0x18] sm:$0xf0] }
 0x113   :  { %v495_v59 = vpop.permute.xlu0 %494  ;;  %v426_v60 = vpack.c.bf16 %v282_v58, %v282_v58  ;;  %v1827_v58 = vld [vmem:[%s2919_s1 + $0x4] sm:$0xf] }
 0x114   :  { %1779 = vmatmul.msk.bf16.vlgmr.msra.gmra.mxu2 %vm183_vm0, %v495_v59 }
 0x115   :  { %v644_v1 = vunpack.c.l.b16 %v426_v60  ;;  %v1730_v60 = vor.u32 %v1829_v56, %v1727_v57 }
 0x117   :  { %327 = vmatpush.bf16.msra.mxu1 %v1730_v60 }
 0x118   :  { %v283_v61 = vpop.f32.mrf.mxu0 }
 0x119   :  { %v284_v63 = vadd.f32 %v283_v61, %v2081_v23  ;;  %v1719_v61 = vld [vmem:[%s2919_s1 + $0x8] sm:$0xf0] }
 0x11a   :  { %612 = vmatpush.bf16.xpose.msra.mxu3 %v602_v0 }
 0x11b   :  { %v427_v2 = vpack.c.bf16 %v284_v63, %v284_v63  ;;  %v499_v33 = vpop.permute.xlu2 %498 }
 0x11d   :  { %v645_v3 = vunpack.c.l.b16 %v427_v2  ;;  %v1722_v2 = vor.u32 %v1827_v58, %v1719_v61 }
 0x11f   :  { %v2174_v4 = vpack.c.b16 %v645_v3, %v644_v1  ;;  %328 = vmatpush.bf16.msra.mxu1 %v1722_v2 }
 0x120   :  { %v286_v5 = vpop.f32.mrf.mxu0 }
 0x121   :  { %656 = vrot.lane.b32.xlu2 %v2174_v4, %s1964_s26  ;;  %v287_v7 = vadd.f32 %v286_v5, %v2081_v23  ;;  %v677_v9 = vsel %vm183_vm0, %v2174_v4, 0 }
 0x122   :  { %613 = vmatpush.bf16.xpose.msra.mxu3 %v599_v6  ;;  %1763 = vmatmul.msk.bf16.vlgmr.msra.gmra.mxu1 %vm183_vm0, %v2017_v12 }
 0x123   :  { %v497_v8 = vpop.permute.xlu1 %496  ;;  %v428_v11 = vpack.c.bf16 %v287_v7, %v287_v7 }
 0x124   :  { %1780 = vmatmul.msk.bf16.gmra.mxu2 %vm183_vm0, %v497_v8 }
 0x125   :  { %v646_v26 = vunpack.c.l.b16 %v428_v11 }
 0x128   :  { %v288_v22 = vpop.f32.mrf.mxu0 }
 0x129   :  { %v289_v24 = vadd.f32 %v288_v22, %v2081_v23 }
 0x12a   :  { %614 = vmatpush.bf16.xpose.msra.mxu3 %v596_v25 }
 0x12b   :  { %v429_v27 = vpack.c.bf16 %v289_v24, %v289_v24 }
 0x12d   :  { %v647_v28 = vunpack.c.l.b16 %v429_v27 }
 0x12f   :  { %v653_v29 = vpack.c.b16 %v647_v28, %v646_v26 }
 0x130   :  { %v291_v30 = vpop.f32.mrf.mxu0 }
 0x131   :  { %658 = vrot.lane.b32.xlu1 %v653_v29, %s1964_s26  ;;  %v292_v46 = vadd.f32 %v291_v30, %v2081_v23 }
 0x132   :  { %1764 = vmatmul.msk.bf16.gmra.mxu1 %vm183_vm0, %v2024_v13 }
 0x133   :  { %v430_v51 = vpack.c.bf16 %v292_v46, %v292_v46 }
 0x134   :  { %1781 = vmatmul.msk.bf16.gmra.mxu2 %vm183_vm0, %v499_v33  ;;  %v680_v33 = vsel %vm183_vm0, %v653_v29, 0 }
 0x135   :  { %v648_v63 = vunpack.c.l.b16 %v430_v51 }
 0x138   :  { %v293_v34 = vpop.f32.mrf.mxu0 }
 0x139   :  { %v294_v47 = vadd.f32 %v293_v34, %v2081_v23 }
 0x13b   :  { %v431_v53 = vpack.c.bf16 %v294_v47, %v294_v47 }
 0x13d   :  { %v649_v0 = vunpack.c.l.b16 %v431_v53 }
 0x13f   :  { %v654_v6 = vpack.c.b16 %v649_v0, %v648_v63 }
 0x140   :  { %v296_v36 = vpop.f32.mrf.mxu0 }
 0x141   :  { %v297_v37 = vadd.f32 %v296_v36, %v2081_v23  ;;  %v683_v22 = vsel %vm183_vm0, %v654_v6, 0 }
 0x142   :  { %1765 = vmatmul.msk.bf16.gmra.mxu1 %vm183_vm0, %v2031_v14 }
 0x143   :  { %v432_v41 = vpack.c.bf16 %v297_v37, %v297_v37 }
 0x145   :  { %v650_v49 = vunpack.c.l.b16 %v432_v41 }
 0x148   :  { %v298_v43 = vpop.f32.mrf.mxu0 }
 0x149   :  { %v299_v48 = vadd.f32 %v298_v43, %v2081_v23 }
 0x14b   :  { %v433_v50 = vpack.c.bf16 %v299_v48, %v299_v48 }
 0x14d   :  { %v651_v54 = vunpack.c.l.b16 %v433_v50 }
 0x14f   :  { %v655_v55 = vpack.c.b16 %v651_v54, %v650_v49 }
 0x150   :  { %v301_v59 = vpop.f32.mrf.mxu0 }
 0x151   :  { %v686_v1 = vsel %vm183_vm0, %v655_v55, 0  ;;  %v302_v3 = vadd.f32 %v301_v59, %v2081_v23 }
 0x152   :  { %692 = vmatpush.bf16.xpose.msrb.mxu2 %v686_v1  ;;  %1766 = vmatmul.msk.bf16.gmra.mxu1 %vm183_vm0, %v2038_v15 }
 0x153   :  { %v576_v5 = vpop.permute.xlu0 %575  ;;  %v434_v7 = vpack.c.bf16 %v302_v3, %v302_v3 }
 0x154   :  { %1783 = vmatmul.msk.bf16.vlgmr.msra.gmra.mxu3 %vm183_vm0, %v576_v5 }
 0x155   :  { %v725_v24 = vunpack.c.l.b16 %v434_v7 }
 0x158   :  { %v303_v8 = vpop.f32.mrf.mxu0 }
 0x159   :  { %v304_v11 = vadd.f32 %v303_v8, %v2081_v23 }
 0x15a   :  { %693 = vmatpush.bf16.xpose.msrb.mxu2 %v683_v22 }
 0x15b   :  { %v435_v25 = vpack.c.bf16 %v304_v11, %v304_v11  ;;  %v501_v26 = vpop.permute.xlu0 %500  ;;  %v580_v43 = vpop.permute.xlu2 %579 }
 0x15c   :  { %1782 = vmatmul.msk.bf16.gmra.mxu2 %vm183_vm0, %v501_v26 }
 0x15d   :  { %v726_v27 = vunpack.c.l.b16 %v435_v25 }
 0x15f   :  { %v2222_v28 = vpack.c.b16 %v726_v27, %v725_v24 }
 0x160   :  { %v306_v30 = vpop.f32.mrf.mxu0 }
 0x161   :  { %737 = vrot.lane.b32.xlu0 %v2222_v28, %s1964_s26  ;;  %v307_v34 = vadd.f32 %v306_v30, %v2081_v23 }
 0x162   :  { %694 = vmatpush.bf16.xpose.msrb.mxu2 %v680_v33  ;;  %1767 = vmatmul.msk.bf16.gmra.mxu1 %vm183_vm0, %v2045_v16 }
 0x163   :  { %v578_v36 = vpop.permute.xlu1 %577  ;;  %v436_v12 = vpack.c.bf16 %v307_v34, %v307_v34 }
 0x164   :  { %1784 = vmatmul.msk.bf16.gmra.mxu3 %vm183_vm0, %v578_v36 }
 0x165   :  { %v727_v29 = vunpack.c.l.b16 %v436_v12 }
 0x168   :  { %v308_v37 = vpop.f32.mrf.mxu0 }
 0x169   :  { %v309_v38 = vadd.f32 %v308_v37, %v2081_v23  ;;  %660 = vrot.lane.b32.xlu0 %v654_v6, %s1964_s26  ;;  %v758_v6 = vsel %vm183_vm0, %v2222_v28, 0 }
 0x16a   :  { %695 = vmatpush.bf16.xpose.msrb.mxu2 %v677_v9 }
 0x16b   :  { %v437_v31 = vpack.c.bf16 %v309_v38, %v309_v38 }
 0x16d   :  { %v728_v39 = vunpack.c.l.b16 %v437_v31 }
 0x16f   :  { %v734_v40 = vpack.c.b16 %v728_v39, %v727_v29 }
 0x170   :  { %v311_v41 = vpop.f32.mrf.mxu0 }
 0x171   :  { %739 = vrot.lane.b32.xlu2 %v734_v40, %s1964_s26  ;;  %v312_v44 = vadd.f32 %v311_v41, %v2081_v23  ;;  %v761_v2 = vsel %vm183_vm0, %v734_v40, 0 }
 0x172   :  { %1768 = vmatmul.msk.bf16.gmra.mxu1 %vm183_vm0, %v2052_v17 }
 0x173   :  { %v438_v46 = vpack.c.bf16 %v312_v44, %v312_v44 }
 0x174   :  { %1785 = vmatmul.msk.bf16.gmra.mxu3 %vm183_vm0, %v580_v43 }
 0x175   :  { %v729_v13 = vunpack.c.l.b16 %v438_v46 }
 0x178   :  { %v313_v47 = vpop.f32.mrf.mxu0 }
 0x179   :  { %v314_v4 = vadd.f32 %v313_v47, %v2081_v23  ;;  %662 = vrot.lane.b32.xlu2 %v655_v55, %s1964_s26 }
 0x17b   :  { %v439_v48 = vpack.c.bf16 %v314_v4, %v314_v4  ;;  %v657_v49 = vpop.permute.xlu2 %656 }
 0x17c   :  { %1787 = vmatmul.msk.bf16.vlgmr.msrb.gmra.mxu2 %vm183_vm0, %v657_v49 }
 0x17d   :  { %v730_v50 = vunpack.c.l.b16 %v439_v48 }
 0x17f   :  { %v735_v51 = vpack.c.b16 %v730_v50, %v729_v13  ;;  %v2337_v50 = vperm.slane %v2073_v20, 1 }
 0x180   :  { %v316_v53 = vpop.f32.mrf.mxu0 }
 0x181   :  { %741 = vrot.lane.b32.xlu1 %v735_v51, %s1964_s26  ;;  %v317_v54 = vadd.f32 %v316_v53, %v2081_v23  ;;  %v764_v1 = vsel %vm183_vm0, %v735_v51, 0 }
 0x182   :  { %1769 = vmatmul.msk.bf16.gmra.mxu1 %vm183_vm0, %v2059_v18 }
 0x183   :  { %v582_v56 = vpop.permute.xlu1 %581  ;;  %v440_v57 = vpack.c.bf16 %v317_v54, %v317_v54 }
 0x184   :  { %1786 = vmatmul.msk.bf16.gmra.mxu3 %vm183_vm0, %v582_v56 }
 0x185   :  { %v731_v14 = vunpack.c.l.b16 %v440_v57 }
 0x188   :  { %v318_v55 = vpop.f32.mrf.mxu0 }
 0x189   :  { %v319_v58 = vadd.f32 %v318_v55, %v2081_v23 }
 0x18b   :  { %v441_v59 = vpack.c.bf16 %v319_v58, %v319_v58 }
 0x18d   :  { %v732_v60 = vunpack.c.l.b16 %v441_v59 }
 0x18f   :  { %v736_v61 = vpack.c.b16 %v732_v60, %v731_v14 }
 0x191   :  { %743 = vrot.lane.b32.xlu0 %v736_v61, %s1964_s26  ;;  %v767_v63 = vsel %vm183_vm0, %v736_v61, 0 }
 0x192   :  { %773 = vmatpush.bf16.xpose.msrb.mxu3 %v767_v63  ;;  %1770 = vmatmul.msk.bf16.gmra.mxu1 %vm183_vm0, %v2066_v19 }
 0x197   :  { %v2251_v0 = vpop.f32.mrf.mxu2 }
 0x198   :  { %v798_v16 = vsel %vm183_vm0, %v2251_v0, -inf }
 0x19a   :  { %774 = vmatpush.bf16.xpose.msrb.mxu3 %v764_v1 }
 0x19f   :  { %v2256_v23 = vpop.f32.mrf.mxu2  ;;  %v2283_v24 = vpop.f32.mrf.mxu1 }
 0x1a0   :  { %v801_v15 = vsel %vm183_vm0, %v2256_v23, -inf }
 0x1a2   :  { %775 = vmatpush.bf16.xpose.msrb.mxu3 %v761_v2  ;;  %802 = vmax.xlane.f32.xlu2 %v801_v15 }
 0x1a3   :  { %v659_v3 = vpop.permute.xlu1 %658  ;;  %1771 = vmatmul.msk.bf16.gmra.mxu1 %vm183_vm0, %v2078_v21 }
 0x1a4   :  { %1788 = vmatmul.msk.bf16.gmra.mxu2 %vm183_vm0, %v659_v3 }
 0x1a7   :  { %v2262_v5 = vpop.f32.mrf.mxu2  ;;  %v2294_v19 = vpop.f32.mrf.mxu1 }
 0x1a8   :  { %v804_v11 = vsel %vm183_vm0, %v2262_v5, -inf }
 0x1aa   :  { %776 = vmatpush.bf16.xpose.msrb.mxu3 %v758_v6  ;;  %v331_v6 = vadd.f32 %v2283_v24, %v2337_v50 }
 0x1ab   :  { %799 = vmax.xlane.f32.xlu1 %v798_v16  ;;  %v333_v16 = vadd.f32 %v2294_v19, %v2337_v50 }
 0x1af   :  { %v2270_v7 = vpop.f32.mrf.mxu2  ;;  %v335_v21 = vpop.f32.mrf.mxu1 }
 0x1b0   :  { %v807_v8 = vsel %vm183_vm0, %v2270_v7, -inf  ;;  %v336_v58 = vadd.f32 %v335_v21, %v2337_v50  ;;  %v442_v21 = vpack.c.bf16 %v331_v6, %v331_v6 }
 0x1b1   :  { %808 = vmax.xlane.f32.xlu2 %v807_v8 }
 0x1b2   :  { %v444_v8 = vpack.c.bf16 %v336_v58, %v336_v58 }
 0x1b3   :  { %805 = vmax.xlane.f32.xlu1 %v804_v11  ;;  %1772 = vmatmul.msk.bf16.gmra.mxu1 %vm183_vm0, %v2092_v32 }
 0x1b7   :  { %v2280_v17 = vpop.f32.mrf.mxu2  ;;  %v337_v39 = vpop.f32.mrf.mxu1 }
 0x1b8   :  { %v810_v38 = vsel %vm183_vm0, %v2280_v17, -inf  ;;  %v338_v59 = vadd.f32 %v337_v39, %v2337_v50 }
 0x1ba   :  { %v445_v11 = vpack.c.bf16 %v338_v59, %v338_v59 }
 0x1bc   :  { %v1302_v24 = vunpack.c.l.b16 %v445_v11 }
 0x1bf   :  { %v2285_v25 = vpop.f32.mrf.mxu2  ;;  %v340_v46 = vpop.f32.mrf.mxu1 }
 0x1c0   :  { %v813_v34 = vsel %vm183_vm0, %v2285_v25, -inf  ;;  %v341_v57 = vadd.f32 %v340_v46, %v2337_v50 }
 0x1c2   :  { %v446_v60 = vpack.c.bf16 %v341_v57, %v341_v57 }
 0x1c3   :  { %1773 = vmatmul.msk.bf16.gmra.mxu1 %vm183_vm0, %v2103_v42 }
 0x1c7   :  { %v342_v4 = vpop.f32.mrf.mxu1 }
 0x1c8   :  { %v343_v55 = vadd.f32 %v342_v4, %v2337_v50 }
 0x1ca   :  { %v447_v63 = vpack.c.bf16 %v343_v55, %v343_v55 }
 0x1cb   :  { %v740_v36 = vpop.permute.xlu2 %739 }
 0x1cf   :  { %v345_v51 = vpop.f32.mrf.mxu1 }
 0x1d0   :  { %v346_v42 = vadd.f32 %v345_v51, %v2337_v50 }
 0x1d2   :  { %v448_v20 = vpack.c.bf16 %v346_v42, %v346_v42 }
 0x1d3   :  { %v738_v22 = vpop.permute.xlu0 %737  ;;  %v663_v31 = vpop.permute.xlu2 %662  ;;  %1774 = vmatmul.msk.bf16.gmra.mxu1 %vm183_vm0, %v2113_v52 }
 0x1d4   :  { %1791 = vmatmul.msk.bf16.vlgmr.msrb.gmra.mxu3 %vm183_vm0, %v738_v22  ;;  %v1305_v2 = vunpack.c.l.b16 %v448_v20  ;;  %v1303_v22 = vunpack.c.l.b16 %v446_v60 }
 0x1d7   :  { %v2287_v26 = vpop.f32.mrf.mxu3  ;;  %v347_v14 = vpop.f32.mrf.mxu1 }
 0x1d8   :  { %v822_v27 = vsel %vm183_vm0, %v2287_v26, -inf  ;;  %v348_v1 = vadd.f32 %v347_v14, %v2337_v50 }
 0x1d9   :  { %823 = vmax.xlane.f32.xlu0 %v822_v27  ;;  %v1304_v27 = vunpack.c.l.b16 %v447_v63 }
 0x1da   :  { %v449_v3 = vpack.c.bf16 %v348_v1, %v348_v1 }
 0x1db   :  { %v661_v18 = vpop.permute.xlu0 %660  ;;  %v1309_v39 = vpack.c.b16 %v1304_v27, %v1303_v22 }
 0x1dc   :  { %1789 = vmatmul.msk.bf16.gmra.mxu2 %vm183_vm0, %v661_v18  ;;  %v1306_v18 = vunpack.c.l.b16 %v449_v3 }
 0x1df   :  { %v2296_v28 = vpop.f32.mrf.mxu2  ;;  %v2298_v30 = vpop.f32.mrf.mxu3 }
 0x1e0   :  { %v825_v33 = vsel %vm183_vm0, %v2298_v30, -inf  ;;  %v816_v9 = vsel %vm183_vm0, %v2296_v28, -inf }
 0x1e1   :  { %826 = vmax.xlane.f32.xlu2 %v825_v33  ;;  %814 = vmax.xlane.f32.xlu0 %v813_v34 }
 0x1e3   :  { %1775 = vmatmul.msk.bf16.gmra.mxu1 %vm183_vm0, %v2123_v62 }
 0x1e4   :  { %1792 = vmatmul.msk.bf16.gmra.mxu3 %vm183_vm0, %v740_v36  ;;  %v1310_v36 = vpack.c.b16 %v1306_v18, %v1305_v2 }
 0x1e6   :  { %1331 = vmatpush.bf16.msra.mxu2 %v1310_v36 }
 0x1e7   :  { %v2305_v12 = vpop.f32.mrf.mxu2  ;;  %v2307_v37 = vpop.f32.mrf.mxu3 }
 0x1e8   :  { %v819_v29 = vsel %vm183_vm0, %v2305_v12, -inf  ;;  %v828_v41 = vsel %vm183_vm0, %v2307_v37, -inf }
 0x1e9   :  { %811 = vmax.xlane.f32.xlu2 %v810_v38  ;;  %817 = vmax.xlane.f32.xlu0 %v816_v9  ;;  %v2366_v9 = vpop.f32.mrf.mxu1 }
 0x1ea   :  { %820 = vmax.xlane.f32.xlu1 %v819_v29  ;;  %v443_v29 = vpack.c.bf16 %v333_v16, %v333_v16  ;;  %1332 = vmatpush.bf16.msra.mxu2 %v1309_v39  ;;  %v351_v39 = vadd.f32 %v2366_v9, %v2337_v50 }
 0x1ec   :  { %1790 = vmatmul.msk.bf16.gmra.mxu2 %vm183_vm0, %v663_v31  ;;  %v1301_v31 = vunpack.c.l.b16 %v444_v8 }
 0x1ef   :  { %v2318_v40 = vpop.f32.mrf.mxu3 }
 0x1f0   :  { %v831_v43 = vsel %vm183_vm0, %v2318_v40, -inf }
 0x1f1   :  { %829 = vmax.xlane.f32.xlu0 %v828_v41 }
 0x1f2   :  { %832 = vmax.xlane.f32.xlu1 %v831_v43  ;;  %v1299_v43 = vunpack.c.l.b16 %v442_v21 }
 0x1f3   :  { %v742_v44 = vpop.permute.xlu1 %741  ;;  %1776 = vmatmul.msk.bf16.gmra.mxu1 %vm183_vm0, %v2136_v10 }
 0x1f4   :  { %1793 = vmatmul.msk.bf16.gmra.mxu3 %vm183_vm0, %v742_v44  ;;  %v1300_v44 = vunpack.c.l.b16 %v443_v29 }
 0x1f7   :  { %v2325_v47 = vpop.f32.mrf.mxu3 }
 0x1f8   :  { %v834_v32 = vsel %vm183_vm0, %v2325_v47, -inf }
 0x1fa   :  { %835 = vmax.xlane.f32.xlu1 %v834_v32  ;;  %v352_v32 = vpop.f32.mrf.mxu1 }
 0x1ff   :  { %v2331_v13 = vpop.f32.mrf.mxu3  ;;  %v2346_v56 = vpop.f32.mrf.mxu2 }
 0x200   :  { %v837_v48 = vsel %vm183_vm0, %v2331_v13, -inf  ;;  %v846_v15 = vsel %vm183_vm0, %v2346_v56, -inf }
 0x201   :  { %838 = vmax.xlane.f32.xlu2 %v837_v48  ;;  %v1307_v48 = vpack.c.b16 %v1300_v44, %v1299_v43 }
 0x202   :  { %v355_v55 = vpop.f32.mrf.mxu1 }
 0x203   :  { %v744_v49 = vpop.permute.xlu0 %743  ;;  %1777 = vmatmul.msk.bf16.gmra.mxu1 %vm183_vm0, %v2151_v35 }
 0x204   :  { %1794 = vmatmul.msk.bf16.gmra.mxu3 %vm183_vm0, %v744_v49 }
 0x207   :  { %v2339_v53 = vpop.f32.mrf.mxu3  ;;  %v2363_v33 = vpop.f32.mrf.mxu2 }
 0x208   :  { %v840_v54 = vsel %vm183_vm0, %v2339_v53, -inf  ;;  %v849_v41 = vsel %vm183_vm0, %v2363_v33, -inf }
 0x209   :  { %841 = vmax.xlane.f32.xlu2 %v840_v54 }
 0x20f   :  { %v2352_v61 = vpop.f32.mrf.mxu3 }
 0x210   :  { %v843_v52 = vsel %vm183_vm0, %v2352_v61, -inf }
 0x211   :  { %844 = vmax.xlane.f32.xlu0 %v843_v52  ;;  %847 = vmax.xlane.f32.xlu2 %v846_v15 }
 0x213   :  { %1778 = vmatmul.msk.bf16.gmra.mxu1 %vm183_vm0, %v2161_v45 }
 0x215   :  { %v803_v34 = vpop.xlane.xlu2 %802 }
 0x216   :  { %v895_v38 = vsub.f32 %v2256_v23, %v803_v34  ;;  %v1308_v23 = vpack.c.b16 %v1302_v24, %v1301_v31  ;;  %v356_v34 = vadd.f32 %v355_v55, %v2337_v50 }
 0x218   :  { %v928_v19 = vmul.f32 1.442695, %v895_v38  ;;  %1333 = vmatpush.bf16.msra.mxu2 %v1308_v23 }
 0x219   :  { %850 = vmax.xlane.f32.xlu0 %v849_v41 }
 0x21a   :  { %1836 = vpow2.f32 %v928_v19  ;;  %v353_v19 = vadd.f32 %v352_v32, %v2337_v50 }
 0x21c   :  { %1334 = vmatpush.bf16.msra.mxu2 %v1307_v48 }
 0x21e   :  { %v800_v46 = vpop.xlane.xlu1 %799 }
 0x21f   :  { %v894_v4 = vsub.f32 %v2251_v0, %v800_v46 }
 0x220   :  { %v2373_v49 = vpop.eup %1836 }
 0x221   :  { %v926_v51 = vmul.f32 1.442695, %v894_v4  ;;  %v993_v54 = vsel %vm183_vm0, %v2373_v49, 0.0 }
 0x222   :  { %994 = vadd.xlane.f32.xlu2 %v993_v54 }
 0x223   :  { %1838 = vpow2.f32 %v926_v51 }
 0x224   :  { %v809_v62 = vpop.xlane.xlu2 %808 }
 0x225   :  { %v897_v42 = vsub.f32 %v2270_v7, %v809_v62  ;;  %v357_v7 = vpop.f32.mrf.mxu1  ;;  %v450_v62 = vpack.c.bf16 %v351_v39, %v351_v39 }
 0x226   :  { %v806_v57 = vpop.xlane.xlu1 %805  ;;  %v358_v36 = vadd.f32 %v357_v7, %v2337_v50 }
 0x227   :  { %v932_v20 = vmul.f32 1.442695, %v897_v42  ;;  %v896_v58 = vsub.f32 %v2262_v5, %v806_v57  ;;  %v2379_v0 = vpop.f32.mrf.mxu2  ;;  %v451_v42 = vpack.c.bf16 %v353_v19, %v353_v19  ;;  %v1384_v7 = vunpack.c.l.b16 %v450_v62 }
 0x228   :  { %v453_v41 = vpack.c.bf16 %v358_v36, %v358_v36  ;;  %v852_v19 = vsel %vm183_vm0, %v2379_v0, -inf }
 0x229   :  { %v2381_v14 = vpop.eup %1838  ;;  %1840 = vpow2.f32 %v932_v20  ;;  %v930_v59 = vmul.f32 1.442695, %v896_v58 }
 0x22a   :  { %v990_v60 = vsel %vm183_vm0, %v2381_v14, 0.0  ;;  %v1387_v32 = vunpack.c.l.b16 %v453_v41 }
 0x22b   :  { %1842 = vpow2.f32 %v930_v59  ;;  %991 = vadd.xlane.f32.xlu1 %v990_v60 }
 0x22d   :  { %v360_v10 = vpop.f32.mrf.mxu1 }
 0x22e   :  { %v361_v8 = vadd.f32 %v360_v10, %v2337_v50 }
 0x22f   :  { %v2387_v63 = vpop.eup %1840  ;;  %v2389_v1 = vpop.f32.mrf.mxu2 }
 0x230   :  { %v855_v5 = vsel %vm183_vm0, %v2389_v1, -inf  ;;  %v999_v15 = vsel %vm183_vm0, %v2387_v63, 0.0  ;;  %v454_v38 = vpack.c.bf16 %v361_v8, %v361_v8 }
 0x231   :  { %v2393_v52 = vpop.eup %1842  ;;  %856 = vmax.xlane.f32.xlu2 %v855_v5  ;;  %v1385_v5 = vunpack.c.l.b16 %v451_v42 }
 0x232   :  { %v996_v2 = vsel %vm183_vm0, %v2393_v52, 0.0  ;;  %v1388_v43 = vunpack.c.l.b16 %v454_v38 }
 0x233   :  { %1000 = vadd.xlane.f32.xlu1 %v999_v15  ;;  %997 = vadd.xlane.f32.xlu0 %v996_v2 }
 0x235   :  { %v362_v3 = vpop.f32.mrf.mxu1 }
 0x236   :  { %v363_v11 = vadd.f32 %v362_v3, %v2337_v50 }
 0x238   :  { %v455_v29 = vpack.c.bf16 %v363_v11, %v363_v11  ;;  %v1392_v11 = vpack.c.b16 %v1385_v5, %v1384_v7 }
 0x23a   :  { %v1389_v44 = vunpack.c.l.b16 %v455_v29 }
 0x23c   :  { %v1394_v59 = vpack.c.b16 %v1389_v44, %v1388_v43 }
 0x23d   :  { %v365_v6 = vpop.f32.mrf.mxu1 }
 0x23e   :  { %v366_v16 = vadd.f32 %v365_v6, %v2337_v50 }
 0x240   :  { %v456_v18 = vpack.c.bf16 %v366_v16, %v366_v16 }
 0x242   :  { %v1390_v45 = vunpack.c.l.b16 %v456_v18 }
 0x245   :  { %v367_v35 = vpop.f32.mrf.mxu1 }
 0x246   :  { %v368_v31 = vadd.f32 %v367_v35, %v2337_v50 }
 0x248   :  { %v457_v24 = vpack.c.bf16 %v368_v31, %v368_v31 }
 0x24a   :  { %v1391_v23 = vunpack.c.l.b16 %v457_v24 }
 0x24c   :  { %v824_v22 = vpop.xlane.xlu0 %823  ;;  %v1395_v54 = vpack.c.b16 %v1391_v23, %v1390_v45 }
 0x24d   :  { %v902_v27 = vsub.f32 %v2287_v26, %v824_v22  ;;  %v452_v26 = vpack.c.bf16 %v356_v34, %v356_v34  ;;  %v2415_v55 = vpop.f32.mrf.mxu1 }
 0x24e   :  { %1416 = vmatpush.bf16.msra.mxu3 %v1395_v54 }
 0x24f   :  { %v942_v21 = vmul.f32 1.442695, %v902_v27  ;;  %v1386_v57 = vunpack.c.l.b16 %v452_v26 }
 0x251   :  { %1844 = vpow2.f32 %v942_v21  ;;  %v1393_v15 = vpack.c.b16 %v1387_v32, %v1386_v57 }
 0x252   :  { %1417 = vmatpush.bf16.msra.mxu3 %v1394_v59 }
 0x254   :  { %v827_v46 = vpop.xlane.xlu2 %826  ;;  %v815_v4 = vpop.xlane.xlu0 %814 }
 0x255   :  { %v903_v48 = vsub.f32 %v2298_v30, %v827_v46  ;;  %v899_v51 = vsub.f32 %v2285_v25, %v815_v4  ;;  %v2428_v16 = vpop.f32.mrf.mxu1 }
 0x256   :  { %1418 = vmatpush.bf16.msra.mxu3 %v1393_v15 }
 0x257   :  { %v2417_v9 = vpop.eup %1844  ;;  %v944_v20 = vmul.f32 1.442695, %v903_v48  ;;  %v936_v58 = vmul.f32 1.442695, %v899_v51  ;;  %v2419_v60 = vpop.f32.mrf.mxu3 }
 0x258   :  { %v870_v30 = vsel %vm183_vm0, %v2419_v60, -inf  ;;  %v1014_v25 = vsel %vm183_vm0, %v2417_v9, 0.0 }
 0x259   :  { %1846 = vpow2.f32 %v944_v20  ;;  %871 = vmax.xlane.f32.xlu1 %v870_v30  ;;  %1015 = vadd.xlane.f32.xlu0 %v1014_v25 }
 0x25a   :  { %1848 = vpow2.f32 %v936_v58  ;;  %1419 = vmatpush.bf16.msra.mxu3 %v1392_v11 }
 0x25c   :  { %v812_v2 = vpop.xlane.xlu2 %811  ;;  %v818_v10 = vpop.xlane.xlu0 %817 }
 0x25d   :  { %v898_v3 = vsub.f32 %v2280_v17, %v812_v2  ;;  %v2426_v6 = vpop.xlane.xlu1 %820  ;;  %v2454_v41 = vpop.f32.mrf.mxu1  ;;  %v900_v32 = vsub.f32 %v2296_v28, %v818_v10 }
 0x25e   :  { %v901_v10 = vsub.f32 %v2305_v12, %v2426_v6 }
 0x25f   :  { %v2430_v8 = vpop.eup %1846  ;;  %v934_v22 = vmul.f32 1.442695, %v898_v3  ;;  %v2432_v27 = vpop.f32.mrf.mxu3  ;;  %v938_v7 = vmul.f32 1.442695, %v900_v32 }
 0x260   :  { %v2434_v18 = vpop.eup %1848  ;;  %v2436_v34 = vpop.f32.mrf.mxu2  ;;  %v1017_v36 = vsel %vm183_vm0, %v2430_v8, 0.0  ;;  %v873_v46 = vsel %vm183_vm0, %v2432_v27, -inf }
 0x261   :  { %1850 = vpow2.f32 %v934_v22  ;;  %1018 = vadd.xlane.f32.xlu1 %v1017_v36  ;;  %v1005_v17 = vsel %vm183_vm0, %v2434_v18, 0.0  ;;  %v858_v25 = vsel %vm183_vm0, %v2436_v34, -inf }
 0x262   :  { %1006 = vadd.xlane.f32.xlu0 %v1005_v17 }
 0x264   :  { %v830_v35 = vpop.xlane.xlu0 %829 }
 0x265   :  { %v833_v21 = vpop.xlane.xlu1 %832  ;;  %v904_v31 = vsub.f32 %v2307_v37, %v830_v35  ;;  %v2465_v48 = vpop.f32.mrf.mxu1  ;;  %v940_v35 = vmul.f32 1.442695, %v901_v10 }
 0x266   :  { %v905_v38 = vsub.f32 %v2318_v40, %v833_v21 }
 0x267   :  { %v2443_v29 = vpop.eup %1850  ;;  %v2446_v45 = vpop.f32.mrf.mxu3  ;;  %v946_v37 = vmul.f32 1.442695, %v904_v31 }
 0x268   :  { %v948_v24 = vmul.f32 1.442695, %v905_v38  ;;  %v876_v39 = vsel %vm183_vm0, %v2446_v45, -inf  ;;  %v1002_v26 = vsel %vm183_vm0, %v2443_v29, 0.0  ;;  %v2456_v40 = vpop.f32.mrf.mxu2 }
 0x269   :  { %853 = vmax.xlane.f32.xlu1 %v852_v19  ;;  %1003 = vadd.xlane.f32.xlu2 %v1002_v26  ;;  %v861_v4 = vsel %vm183_vm0, %v2456_v40, -inf }
 0x26a   :  { %1852 = vpow2.f32 %v948_v24  ;;  %877 = vmax.xlane.f32.xlu0 %v876_v39 }
 0x26b   :  { %1854 = vpow2.f32 %v946_v37 }
 0x26d   :  { %v836_v43 = vpop.xlane.xlu1 %835  ;;  %v380_v30 = vpop.f32.mrf.mxu1 }
 0x26e   :  { %v906_v44 = vsub.f32 %v2325_v47, %v836_v43  ;;  %v381_v32 = vadd.f32 %v380_v30, %v2337_v50  ;;  %v378_v30 = vadd.f32 %v2465_v48, %v2337_v50 }
 0x26f   :  { %v2469_v54 = vpop.f32.mrf.mxu3 }
 0x270   :  { %v2459_v23 = vpop.eup %1852  ;;  %v950_v62 = vmul.f32 1.442695, %v906_v44  ;;  %v2471_v47 = vpop.f32.mrf.mxu2  ;;  %v879_v59 = vsel %vm183_vm0, %v2469_v54, -inf }
 0x271   :  { %v1023_v51 = vsel %vm183_vm0, %v2459_v23, 0.0  ;;  %874 = vmax.xlane.f32.xlu2 %v873_v46  ;;  %862 = vmax.xlane.f32.xlu1 %v861_v4  ;;  %v2473_v57 = vpop.eup %1854 }
 0x272   :  { %1024 = vadd.xlane.f32.xlu0 %v1023_v51  ;;  %1856 = vpow2.f32 %v950_v62  ;;  %v1020_v58 = vsel %vm183_vm0, %v2473_v57, 0.0 }
 0x273   :  { %1858 = vpow2.f32 %v938_v7 }
 0x274   :  { %v839_v42 = vpop.xlane.xlu2 %838 }
 0x275   :  { %v907_v20 = vsub.f32 %v2331_v13, %v839_v42  ;;  %v382_v17 = vpop.f32.mrf.mxu1 }
 0x277   :  { %v952_v5 = vmul.f32 1.442695, %v907_v20  ;;  %v2483_v15 = vpop.f32.mrf.mxu3  ;;  %v383_v20 = vadd.f32 %v382_v17, %v2337_v50 }
 0x278   :  { %v2485_v2 = vpop.eup %1856  ;;  %v2487_v13 = vpop.f32.mrf.mxu2  ;;  %v882_v11 = vsel %vm183_vm0, %v2483_v15, -inf }
 0x279   :  { %1021 = vadd.xlane.f32.xlu2 %v1020_v58  ;;  %880 = vmax.xlane.f32.xlu1 %v879_v59  ;;  %1860 = vpow2.f32 %v952_v5  ;;  %v1026_v22 = vsel %vm183_vm0, %v2485_v2, 0.0  ;;  %v867_v36 = vsel %vm183_vm0, %v2487_v13, -inf  ;;  %v2498_v21 = vpop.eup %1858 }
 0x27a   :  { %859 = vmax.xlane.f32.xlu0 %v858_v25  ;;  %1862 = vpow2.f32 %v940_v35  ;;  %v1008_v37 = vsel %vm183_vm0, %v2498_v21, 0.0 }
 0x27c   :  { %v842_v28 = vpop.xlane.xlu2 %841 }
 0x27d   :  { %v908_v3 = vsub.f32 %v2339_v53, %v842_v28  ;;  %v385_v43 = vpop.f32.mrf.mxu1 }
 0x27f   :  { %v954_v12 = vmul.f32 1.442695, %v908_v3  ;;  %v2500_v38 = vpop.eup %1860  ;;  %v2503_v24 = vpop.f32.mrf.mxu3  ;;  %v462_v3 = vpack.c.bf16 %v381_v32, %v381_v32 }
 0x280   :  { %v1029_v26 = vsel %vm183_vm0, %v2500_v38, 0.0  ;;  %v2512_v4 = vpop.eup %1862 }
 0x281   :  { %883 = vmax.xlane.f32.xlu2 %v882_v11  ;;  %1027 = vadd.xlane.f32.xlu1 %v1026_v22  ;;  %1864 = vpow2.f32 %v954_v12  ;;  %v1011_v58 = vsel %vm183_vm0, %v2512_v4, 0.0  ;;  %v463_v11 = vpack.c.bf16 %v383_v20, %v383_v20  ;;  %v371_v12 = vadd.f32 %v2415_v55, %v2337_v50 }
 0x282   :  { %868 = vmax.xlane.f32.xlu0 %v867_v36 }
 0x284   :  { %v845_v6 = vpop.xlane.xlu0 %844  ;;  %v848_v31 = vpop.xlane.xlu2 %847 }
 0x285   :  { %v909_v53 = vsub.f32 %v2352_v61, %v845_v6  ;;  %v910_v19 = vsub.f32 %v2346_v56, %v848_v31  ;;  %v885_v61 = vsel %vm183_vm0, %v2503_v24, -inf  ;;  %v386_v56 = vadd.f32 %v385_v43, %v2337_v50  ;;  %v387_v5 = vpop.f32.mrf.mxu1 }
 0x286   :  { %v388_v22 = vadd.f32 %v387_v5, %v2337_v50  ;;  %v461_v6 = vpack.c.bf16 %v378_v30, %v378_v30  ;;  %v1473_v31 = vunpack.c.l.b16 %v462_v3 }
 0x287   :  { %v956_v39 = vmul.f32 1.442695, %v909_v53  ;;  %v958_v44 = vmul.f32 1.442695, %v910_v19  ;;  %v2515_v51 = vpop.eup %1864  ;;  %v464_v7 = vpack.c.bf16 %v386_v56, %v386_v56  ;;  %v2532_v28 = vpop.f32.mrf.mxu3 }
 0x288   :  { %v1032_v25 = vsel %vm183_vm0, %v2515_v51, 0.0  ;;  %v465_v17 = vpack.c.bf16 %v388_v22, %v388_v22  ;;  %v1472_v56 = vunpack.c.l.b16 %v461_v6 }
 0x289   :  { %1866 = vpow2.f32 %v956_v39  ;;  %1030 = vadd.xlane.f32.xlu2 %v1029_v26  ;;  %1009 = vadd.xlane.f32.xlu1 %v1008_v37  ;;  %v1475_v36 = vunpack.c.l.b16 %v464_v7  ;;  %v1474_v39 = vunpack.c.l.b16 %v463_v11  ;;  %v888_v26 = vsel %vm183_vm0, %v2532_v28, -inf }
 0x28a   :  { %886 = vmax.xlane.f32.xlu0 %v885_v61  ;;  %1868 = vpow2.f32 %v958_v44  ;;  %v1476_v19 = vunpack.c.l.b16 %v465_v17  ;;  %v864_v37 = vsel %vm183_vm0, %v2471_v47, -inf  ;;  %v458_v61 = vpack.c.bf16 %v371_v12, %v371_v12 }
 0x28c   :  { %v851_v46 = vpop.xlane.xlu0 %850 }
 0x28d   :  { %v911_v42 = vsub.f32 %v2363_v33, %v851_v46  ;;  %v376_v33 = vadd.f32 %v2454_v41, %v2337_v50  ;;  %v373_v41 = vadd.f32 %v2428_v16, %v2337_v50  ;;  %v1480_v16 = vpack.c.b16 %v1476_v19, %v1475_v36  ;;  %v2547_v43 = vpop.f32.mrf.mxu1 }
 0x28f   :  { %v2517_v62 = vpop.eup %1866  ;;  %v960_v10 = vmul.f32 1.442695, %v911_v42  ;;  %v460_v48 = vpack.c.bf16 %v376_v33, %v376_v33  ;;  %v459_v44 = vpack.c.bf16 %v373_v41, %v373_v41  ;;  %v1479_v42 = vpack.c.b16 %v1474_v39, %v1473_v31  ;;  %1501 = vmatpush.bf16.msrb.mxu2 %v1480_v16  ;;  %v2551_v20 = vpop.f32.mrf.mxu3 }
 0x290   :  { %v1035_v59 = vsel %vm183_vm0, %v2517_v62, 0.0  ;;  %v2535_v35 = vpop.eup %1868  ;;  %v891_v5 = vsel %vm183_vm0, %v2551_v20, -inf }
 0x291   :  { %1012 = vadd.xlane.f32.xlu2 %v1011_v58  ;;  %1036 = vadd.xlane.f32.xlu1 %v1035_v59  ;;  %1870 = vpow2.f32 %v960_v10  ;;  %v1038_v55 = vsel %vm183_vm0, %v2535_v35, 0.0  ;;  %v1471_v46 = vunpack.c.l.b16 %v460_v48  ;;  %v1470_v7 = vunpack.c.l.b16 %v459_v44 }
 0x292   :  { %1033 = vadd.xlane.f32.xlu0 %v1032_v25  ;;  %v1469_v25 = vunpack.c.l.b16 %v458_v61 }
 0x293   :  { %v1478_v33 = vpack.c.b16 %v1472_v56, %v1471_v46  ;;  %1502 = vmatpush.bf16.msrb.mxu2 %v1479_v42 }
 0x294   :  { %v1477_v11 = vpack.c.b16 %v1470_v7, %v1469_v25 }
 0x295   :  { %v995_v53 = vpop.xlane.xlu2 %994  ;;  %v2558_v3 = vpop.f32.mrf.mxu1 }
 0x296   :  { %1872 = vrcp.f32 %v995_v53 }
 0x297   :  { %v2549_v32 = vpop.eup %1870  ;;  %1503 = vmatpush.bf16.msrb.mxu2 %v1478_v33 }
 0x298   :  { %v1041_v30 = vsel %vm183_vm0, %v2549_v32, 0.0 }
 0x299   :  { %889 = vmax.xlane.f32.xlu1 %v888_v26  ;;  %865 = vmax.xlane.f32.xlu2 %v864_v37 }
 0x29a   :  { %1039 = vadd.xlane.f32.xlu0 %v1038_v55 }
 0x29b   :  { %1504 = vmatpush.bf16.msrb.mxu2 %v1477_v11 }
 0x29c   :  { %v1873_v59 = vpop.eup %1872 }
 0x29d   :  { %v1119_v10 = vmul.f32 %v1873_v59, %v2373_v49  ;;  %v395_v19 = vpop.f32.mrf.mxu1 }
 0x29e   :  { %v992_v58 = vpop.xlane.xlu1 %991 }
 0x29f   :  { %1874 = vrcp.f32 %v992_v58  ;;  %v1240_v36 = vpack.c.bf16 %v1119_v10, %v1119_v10  ;;  %v1151_v48 = vsel %vm183_vm0, %v1119_v10, 0.0 }
 0x2a1   :  { %1042 = vadd.xlane.f32.xlu1 %v1041_v30  ;;  %892 = vmax.xlane.f32.xlu2 %v891_v5  ;;  %v1280_v49 = vunpack.c.l.b16 %v1240_v36 }
 0x2a4   :  { %v857_v10 = vpop.xlane.xlu2 %856 }
 0x2a5   :  { %v1875_v22 = vpop.eup %1874  ;;  %v397_v46 = vpop.f32.mrf.mxu1 }
 0x2a6   :  { %v1118_v17 = vmul.f32 %v1875_v22, %v2381_v14  ;;  %v1001_v12 = vpop.xlane.xlu1 %1000  ;;  %v998_v41 = vpop.xlane.xlu0 %997 }
 0x2a7   :  { %1876 = vrcp.f32 %v1001_v12 }
 0x2a8   :  { %v1150_v6 = vsel %vm183_vm0, %v1118_v17, 0.0  ;;  %v1239_v53 = vpack.c.bf16 %v1118_v17, %v1118_v17  ;;  %1878 = vrcp.f32 %v998_v41  ;;  %v913_v17 = vsub.f32 %v2389_v1, %v857_v10 }
 0x2a9   :  { %v1152_v31 = vadd.f32 %v1151_v48, %v1150_v6 }
 0x2aa   :  { %v1279_v39 = vunpack.c.l.b16 %v1239_v53  ;;  %v964_v53 = vmul.f32 1.442695, %v913_v17 }
 0x2ac   :  { %v1287_v26 = vpack.c.b16 %v1280_v49, %v1279_v39  ;;  %v398_v49 = vadd.f32 %v397_v46, %v2337_v50 }
 0x2ad   :  { %v1877_v37 = vpop.eup %1876  ;;  %v400_v33 = vpop.f32.mrf.mxu1 }
 0x2ae   :  { %v1879_v55 = vpop.eup %1878  ;;  %1795 = vmatmul.msk.bf16.vlgmr.msra.gmra.mxu2 %vm183_vm0, %v1287_v26  ;;  %v1121_v14 = vmul.f32 %v1877_v37, %v2387_v63  ;;  %v401_v41 = vadd.f32 %v400_v33, %v2337_v50  ;;  %v469_v46 = vpack.c.bf16 %v398_v49, %v398_v49 }
 0x2af   :  { %v1120_v16 = vmul.f32 %v1879_v55, %v2393_v52 }
 0x2b0   :  { %v1155_v56 = vsel %vm183_vm0, %v1121_v14, 0.0  ;;  %v1242_v58 = vpack.c.bf16 %v1121_v14, %v1121_v14  ;;  %v470_v26 = vpack.c.bf16 %v401_v41, %v401_v41  ;;  %v391_v14 = vadd.f32 %v2547_v43, %v2337_v50 }
 0x2b1   :  { %v1153_v61 = vsel %vm183_vm0, %v1120_v16, 0.0  ;;  %v1241_v42 = vpack.c.bf16 %v1120_v16, %v1120_v16 }
 0x2b2   :  { %v1154_v44 = vadd.f32 %v1153_v61, %v1152_v31  ;;  %v1282_v7 = vunpack.c.l.b16 %v1242_v58  ;;  %v396_v31 = vadd.f32 %v395_v19, %v2337_v50  ;;  %v393_v19 = vadd.f32 %v2558_v3, %v2337_v50 }
 0x2b3   :  { %v1281_v25 = vunpack.c.l.b16 %v1241_v42  ;;  %v1558_v58 = vunpack.c.l.b16 %v470_v26  ;;  %v1557_v3 = vunpack.c.l.b16 %v469_v46 }
 0x2b4   :  { %v2568_v59 = vadd.f32 %v1155_v56, %v1154_v44  ;;  %v468_v56 = vpack.c.bf16 %v396_v31, %v396_v31  ;;  %v467_v10 = vpack.c.bf16 %v393_v19, %v393_v19 }
 0x2b5   :  { %v1288_v30 = vpack.c.b16 %v1282_v7, %v1281_v25  ;;  %v402_v5 = vpop.f32.mrf.mxu1 }
 0x2b6   :  { %v403_v48 = vadd.f32 %v402_v5, %v2337_v50  ;;  %v466_v5 = vpack.c.bf16 %v391_v14, %v391_v14  ;;  %v1555_v31 = vunpack.c.l.b16 %v467_v10 }
 0x2bd   :  { %v405_v63 = vpop.f32.mrf.mxu1 }
 0x2be   :  { %1796 = vmatmul.msk.bf16.gmra.mxu2 %vm183_vm0, %v1288_v30  ;;  %v406_v36 = vadd.f32 %v405_v63, %v2337_v50 }
 0x2c0   :  { %v472_v6 = vpack.c.bf16 %v406_v36, %v406_v36 }
 0x2c2   :  { %v1560_v61 = vunpack.c.l.b16 %v472_v6 }
 0x2c5   :  { %v407_v39 = vpop.f32.mrf.mxu1 }
 0x2c6   :  { %v408_v37 = vadd.f32 %v407_v39, %v2337_v50  ;;  %v1556_v50 = vunpack.c.l.b16 %v468_v56 }
 0x2c8   :  { %v473_v44 = vpack.c.bf16 %v408_v37, %v408_v37  ;;  %v1563_v49 = vpack.c.b16 %v1557_v3, %v1556_v50 }
 0x2ca   :  { %v1561_v7 = vunpack.c.l.b16 %v473_v44 }
 0x2cc   :  { %v872_v52 = vpop.xlane.xlu1 %871  ;;  %v1016_v11 = vpop.xlane.xlu0 %1015  ;;  %v1565_v30 = vpack.c.b16 %v1561_v7, %v1560_v61 }
 0x2cd   :  { %v918_v22 = vsub.f32 %v2419_v60, %v872_v52  ;;  %1880 = vrcp.f32 %v1016_v11  ;;  %v471_v60 = vpack.c.bf16 %v403_v48, %v403_v48 }
 0x2ce   :  { %1586 = vmatpush.bf16.msrb.mxu3 %v1565_v30 }
 0x2cf   :  { %v974_v12 = vmul.f32 1.442695, %v918_v22  ;;  %v1559_v25 = vunpack.c.l.b16 %v471_v60 }
 0x2d1   :  { %1882 = vpow2.f32 %v974_v12  ;;  %v1564_v52 = vpack.c.b16 %v1559_v25, %v1558_v58 }
 0x2d3   :  { %v1881_v1 = vpop.eup %1880  ;;  %1587 = vmatpush.bf16.msrb.mxu3 %v1564_v52 }
 0x2d4   :  { %v1019_v55 = vpop.xlane.xlu1 %1018  ;;  %v2586_v33 = vmul.f32 %v1881_v1, %v2417_v9 }
 0x2d5   :  { %1884 = vrcp.f32 %v1019_v55  ;;  %v1007_v16 = vpop.xlane.xlu0 %1006 }
 0x2d6   :  { %1886 = vpow2.f32 %v964_v53  ;;  %v1247_v22 = vpack.c.bf16 %v2586_v33, %v2586_v33  ;;  %v1554_v53 = vunpack.c.l.b16 %v466_v5 }
 0x2d7   :  { %v2583_v42 = vpop.eup %1882  ;;  %1888 = vrcp.f32 %v1007_v16  ;;  %1588 = vmatpush.bf16.msrb.mxu3 %v1563_v49 }
 0x2d8   :  { %v1062_v43 = vsel %vm183_vm0, %v2583_v42, 0.0  ;;  %v1364_v26 = vunpack.c.l.b16 %v1247_v22  ;;  %v1562_v1 = vpack.c.b16 %v1555_v31, %v1554_v53 }
 0x2d9   :  { %1063 = vadd.xlane.f32.xlu2 %v1062_v43 }
 0x2db   :  { %v1885_v63 = vpop.eup %1884  ;;  %1589 = vmatpush.bf16.msrb.mxu3 %v1562_v1 }
 0x2dc   :  { %v2590_v11 = vpop.eup %1886  ;;  %v2595_v9 = vmul.f32 %v1885_v63, %v2430_v8  ;;  %v854_v36 = vpop.xlane.xlu1 %853 }
 0x2dd   :  { %v1004_v17 = vpop.xlane.xlu2 %1003  ;;  %v1889_v12 = vpop.eup %1888  ;;  %v912_v48 = vsub.f32 %v2379_v0, %v854_v36  ;;  %v1047_v37 = vsel %vm183_vm0, %v2590_v11, 0.0 }
 0x2de   :  { %v878_v41 = vpop.xlane.xlu0 %877  ;;  %1890 = vrcp.f32 %v1004_v17  ;;  %v1248_v6 = vpack.c.bf16 %v2595_v9, %v2595_v9  ;;  %v2601_v8 = vmul.f32 %v1889_v12, %v2434_v18 }
 0x2df   :  { %v962_v39 = vmul.f32 1.442695, %v912_v48  ;;  %v920_v58 = vsub.f32 %v2446_v45, %v878_v41 }
 0x2e0   :  { %v1365_v60 = vunpack.c.l.b16 %v1248_v6  ;;  %v1244_v18 = vpack.c.bf16 %v2601_v8, %v2601_v8 }
 0x2e1   :  { %1892 = vpow2.f32 %v962_v39  ;;  %1048 = vadd.xlane.f32.xlu2 %v1047_v37  ;;  %v978_v5 = vmul.f32 1.442695, %v920_v58 }
 0x2e2   :  { %v1372_v0 = vpack.c.b16 %v1365_v60, %v1364_v26  ;;  %v1284_v43 = vunpack.c.l.b16 %v1244_v18 }
 0x2e4   :  { %v1891_v55 = vpop.eup %1890  ;;  %1799 = vmatmul.msk.bf16.vlgmr.msra.gmra.mxu3 %vm183_vm0, %v1372_v0  ;;  %v863_v61 = vpop.xlane.xlu1 %862 }
 0x2e5   :  { %v2606_v14 = vmul.f32 %v1891_v55, %v2443_v29  ;;  %v875_v16 = vpop.xlane.xlu2 %874  ;;  %v915_v3 = vsub.f32 %v2456_v40, %v863_v61 }
 0x2e6   :  { %v1025_v44 = vpop.xlane.xlu0 %1024  ;;  %v919_v19 = vsub.f32 %v2432_v27, %v875_v16 }
 0x2e7   :  { %v1243_v56 = vpack.c.bf16 %v2606_v14, %v2606_v14  ;;  %v2614_v46 = vpop.eup %1892  ;;  %1894 = vrcp.f32 %v1025_v44  ;;  %v968_v48 = vmul.f32 1.442695, %v915_v3 }
 0x2e8   :  { %v976_v29 = vmul.f32 1.442695, %v919_v19  ;;  %v1044_v25 = vsel %vm183_vm0, %v2614_v46, 0.0 }
 0x2e9   :  { %v1283_v7 = vunpack.c.l.b16 %v1243_v56  ;;  %1045 = vadd.xlane.f32.xlu1 %v1044_v25 }
 0x2ea   :  { %1896 = vpow2.f32 %v976_v29 }
 0x2eb   :  { %v1289_v30 = vpack.c.b16 %v1284_v43, %v1283_v7 }
 0x2ec   :  { %v881_v63 = vpop.xlane.xlu1 %880 }
 0x2ed   :  { %1797 = vmatmul.msk.bf16.gmra.mxu2 %vm183_vm0, %v1289_v30  ;;  %v1022_v27 = vpop.xlane.xlu2 %1021  ;;  %v1895_v10 = vpop.eup %1894  ;;  %v921_v45 = vsub.f32 %v2469_v54, %v881_v63 }
 0x2ee   :  { %1898 = vrcp.f32 %v1022_v27  ;;  %v860_v50 = vpop.xlane.xlu0 %859  ;;  %v2626_v17 = vmul.f32 %v1895_v10, %v2459_v23  ;;  %v1172_v27 = vsel %vm183_vm0, %v2595_v9, 0.0 }
 0x2ef   :  { %v914_v52 = vsub.f32 %v2436_v34, %v860_v50  ;;  %1900 = vpow2.f32 %v978_v5  ;;  %v980_v36 = vmul.f32 1.442695, %v921_v45  ;;  %v1157_v45 = vsel %vm183_vm0, %v2606_v14, 0.0 }
 0x2f0   :  { %v2623_v22 = vpop.eup %1896  ;;  %v1250_v53 = vpack.c.bf16 %v2626_v17, %v2626_v17 }
 0x2f1   :  { %v966_v12 = vmul.f32 1.442695, %v914_v52  ;;  %v1065_v41 = vsel %vm183_vm0, %v2623_v22, 0.0  ;;  %1902 = vpow2.f32 %v980_v36 }
 0x2f2   :  { %1066 = vadd.xlane.f32.xlu0 %v1065_v41  ;;  %v1367_v16 = vunpack.c.l.b16 %v1250_v53  ;;  %v1176_v53 = vsel %vm183_vm0, %v2626_v17, 0.0 }
 0x2f3   :  { %1904 = vpow2.f32 %v966_v12 }
 0x2f4   :  { %v1899_v54 = vpop.eup %1898  ;;  %v1028_v34 = vpop.xlane.xlu1 %1027  ;;  %1906 = vpow2.f32 %v968_v48 }
 0x2f5   :  { %v1128_v40 = vmul.f32 %v1899_v54, %v2473_v57  ;;  %v884_v6 = vpop.xlane.xlu2 %883  ;;  %v2633_v31 = vpop.eup %1900  ;;  %1908 = vrcp.f32 %v1028_v34 }
 0x2f6   :  { %v922_v23 = vsub.f32 %v2483_v15, %v884_v6  ;;  %v869_v49 = vpop.xlane.xlu0 %868  ;;  %v1068_v55 = vsel %vm183_vm0, %v2633_v31, 0.0 }
 0x2f7   :  { %v1249_v39 = vpack.c.bf16 %v1128_v40, %v1128_v40  ;;  %v2636_v26 = vpop.eup %1902  ;;  %v917_v37 = vsub.f32 %v2487_v13, %v869_v49  ;;  %v1174_v10 = vsel %vm183_vm0, %v1128_v40, 0.0  ;;  %v1158_v40 = vadd.f32 %v1157_v45, %v2568_v59 }
 0x2f8   :  { %v982_v60 = vmul.f32 1.442695, %v922_v23  ;;  %v1071_v57 = vsel %vm183_vm0, %v2636_v26, 0.0  ;;  %v1159_v59 = vsel %vm183_vm0, %v2601_v8, 0.0 }
 0x2f9   :  { %v2639_v0 = vpop.eup %1904  ;;  %v1366_v1 = vunpack.c.l.b16 %v1249_v39  ;;  %1072 = vadd.xlane.f32.xlu1 %v1071_v57  ;;  %v972_v18 = vmul.f32 1.442695, %v917_v37 }
 0x2fa   :  { %1910 = vpow2.f32 %v982_v60  ;;  %v1050_v15 = vsel %vm183_vm0, %v2639_v0, 0.0  ;;  %1069 = vadd.xlane.f32.xlu0 %v1068_v55  ;;  %v2647_v13 = vpop.eup %1906  ;;  %v1160_v55 = vadd.f32 %v1159_v59, %v1158_v40 }
 0x2fb   :  { %1051 = vadd.xlane.f32.xlu2 %v1050_v15  ;;  %v1373_v61 = vpack.c.b16 %v1367_v16, %v1366_v1  ;;  %v1909_v56 = vpop.eup %1908  ;;  %v1053_v5 = vsel %vm183_vm0, %v2647_v13, 0.0 }
 0x2fc   :  { %v1010_v19 = vpop.xlane.xlu1 %1009  ;;  %v1130_v7 = vmul.f32 %v1909_v56, %v2485_v2 }
 0x2fd   :  { %1800 = vmatmul.msk.bf16.gmra.mxu3 %vm183_vm0, %v1373_v61  ;;  %v1031_v44 = vpop.xlane.xlu2 %1030 }
 0x2fe   :  { %1912 = vrcp.f32 %v1031_v44  ;;  %v887_v58 = vpop.xlane.xlu0 %886  ;;  %v1251_v12 = vpack.c.bf16 %v1130_v7, %v1130_v7  ;;  %v1178_v23 = vsel %vm183_vm0, %v1130_v7, 0.0 }
 0x2ff   :  { %1914 = vrcp.f32 %v1010_v19  ;;  %v923_v29 = vsub.f32 %v2503_v24, %v887_v58  ;;  %v1171_v24 = vsel %vm183_vm0, %v2586_v33, 0.0 }
 0x300   :  { %v2651_v25 = vpop.eup %1910  ;;  %1916 = vpow2.f32 %v972_v18  ;;  %v1173_v50 = vadd.f32 %v1172_v27, %v1171_v24  ;;  %v1368_v14 = vunpack.c.l.b16 %v1251_v12 }
 0x301   :  { %v984_v43 = vmul.f32 1.442695, %v923_v29  ;;  %v1074_v30 = vsel %vm183_vm0, %v2651_v25, 0.0 }
 0x302   :  { %1075 = vadd.xlane.f32.xlu1 %v1074_v30  ;;  %1054 = vadd.xlane.f32.xlu0 %v1053_v5  ;;  %v1175_v48 = vadd.f32 %v1174_v10, %v1173_v50 }
 0x303   :  { %1918 = vpow2.f32 %v984_v43 }
 0x304   :  { %v1913_v63 = vpop.eup %1912  ;;  %v1037_v36 = vpop.xlane.xlu1 %1036  ;;  %v1177_v49 = vadd.f32 %v1176_v53, %v1175_v48 }
 0x305   :  { %v1915_v2 = vpop.eup %1914  ;;  %v1131_v3 = vmul.f32 %v1913_v63, %v2500_v38  ;;  %v1013_v52 = vpop.xlane.xlu2 %1012 }
 0x306   :  { %v2666_v9 = vpop.eup %1916  ;;  %1920 = vrcp.f32 %v1013_v52  ;;  %v1034_v41 = vpop.xlane.xlu0 %1033  ;;  %v1124_v54 = vmul.f32 %v1915_v2, %v2498_v21  ;;  %v1179_v17 = vadd.f32 %v1178_v23, %v1177_v49 }
 0x307   :  { %1922 = vrcp.f32 %v1037_v36  ;;  %v1252_v33 = vpack.c.bf16 %v1131_v3, %v1131_v3  ;;  %v1059_v38 = vsel %vm183_vm0, %v2666_v9, 0.0  ;;  %v1180_v57 = vsel %vm183_vm0, %v1131_v3, 0.0 }
 0x308   :  { %1924 = vrcp.f32 %v1034_v41  ;;  %v1161_v39 = vsel %vm183_vm0, %v1124_v54, 0.0  ;;  %v1245_v18 = vpack.c.bf16 %v1124_v54, %v1124_v54  ;;  %v1181_v7 = vadd.f32 %v1180_v57, %v1179_v17 }
 0x309   :  { %v2670_v6 = vpop.eup %1918  ;;  %v1369_v34 = vunpack.c.l.b16 %v1252_v33  ;;  %v1162_v8 = vadd.f32 %v1161_v39, %v1160_v55 }
 0x30a   :  { %1060 = vadd.xlane.f32.xlu1 %v1059_v38  ;;  %v1077_v21 = vsel %vm183_vm0, %v2670_v6, 0.0  ;;  %v1285_v10 = vunpack.c.l.b16 %v1245_v18 }
 0x30b   :  { %1078 = vadd.xlane.f32.xlu2 %v1077_v21  ;;  %v1374_v60 = vpack.c.b16 %v1369_v34, %v1368_v14 }
 0x30c   :  { %v1921_v37 = vpop.eup %1920  ;;  %v890_v15 = vpop.xlane.xlu1 %889 }
 0x30d   :  { %v1923_v1 = vpop.eup %1922  ;;  %v1125_v16 = vmul.f32 %v1921_v37, %v2512_v4  ;;  %1801 = vmatmul.msk.bf16.gmra.mxu3 %vm183_vm0, %v1374_v60  ;;  %v866_v61 = vpop.xlane.xlu2 %865  ;;  %v924_v56 = vsub.f32 %v2532_v28, %v890_v15 }
 0x30e   :  { %v1925_v44 = vpop.eup %1924  ;;  %v1133_v19 = vmul.f32 %v1923_v1, %v2517_v62  ;;  %v916_v58 = vsub.f32 %v2471_v47, %v866_v61  ;;  %v1040_v29 = vpop.xlane.xlu0 %1039 }
 0x30f   :  { %v1163_v43 = vsel %vm183_vm0, %v1125_v16, 0.0  ;;  %v1132_v30 = vmul.f32 %v1925_v44, %v2515_v51  ;;  %v1246_v4 = vpack.c.bf16 %v1125_v16, %v1125_v16  ;;  %v986_v27 = vmul.f32 1.442695, %v924_v56 }
 0x310   :  { %v1164_v5 = vadd.f32 %v1163_v43, %v1162_v8  ;;  %v970_v63 = vmul.f32 1.442695, %v916_v58  ;;  %1926 = vrcp.f32 %v1040_v29  ;;  %v1184_v28 = vsel %vm183_vm0, %v1133_v19, 0.0 }
 0x311   :  { %v1182_v24 = vsel %vm183_vm0, %v1132_v30, 0.0  ;;  %v1286_v2 = vunpack.c.l.b16 %v1246_v4  ;;  %1928 = vpow2.f32 %v986_v27  ;;  %v1253_v45 = vpack.c.bf16 %v1132_v30, %v1132_v30 }
 0x312   :  { %v1165_v62 = vrot.slane %v1164_v5, 4  ;;  %v1183_v50 = vadd.f32 %v1182_v24, %v1181_v7  ;;  %1930 = vpow2.f32 %v970_v63  ;;  %v1254_v3 = vpack.c.bf16 %v1133_v19, %v1133_v19 }
 0x313   :  { %v1290_v47 = vpack.c.b16 %v1286_v2, %v1285_v10  ;;  %v1370_v40 = vunpack.c.l.b16 %v1253_v45 }
 0x314   :  { %v1166_v52 = vadd.f32 %v1165_v62, %v1164_v5  ;;  %v1185_v51 = vadd.f32 %v1184_v28, %v1183_v50  ;;  %v1043_v36 = vpop.xlane.xlu1 %1042  ;;  %v1371_v38 = vunpack.c.l.b16 %v1254_v3 }
 0x315   :  { %1798 = vmatmul.msk.bf16.gmra.mxu2 %vm183_vm0, %v1290_v47  ;;  %v893_v12 = vpop.xlane.xlu2 %892  ;;  %1932 = vrcp.f32 %v1043_v36 }
 0x316   :  { %v1927_v41 = vpop.eup %1926  ;;  %v1167_v48 = vrot.slane %v1166_v52, 2  ;;  %v1186_v54 = vrot.slane %v1185_v51, 4  ;;  %v925_v33 = vsub.f32 %v2551_v20, %v893_v12  ;;  %v1375_v20 = vpack.c.b16 %v1371_v38, %v1370_v40 }
 0x317   :  { %v2694_v14 = vpop.eup %1928  ;;  %v1134_v21 = vmul.f32 %v1927_v41, %v2535_v35 }
 0x318   :  { %v1168_v34 = vadd.f32 %v1167_v48, %v1166_v52  ;;  %v1187_v53 = vadd.f32 %v1186_v54, %v1185_v51  ;;  %v2696_v23 = vpop.eup %1930  ;;  %v988_v59 = vmul.f32 1.442695, %v925_v33  ;;  %v1080_v49 = vsel %vm183_vm0, %v2694_v14, 0.0 }
 0x319   :  { %v1056_v37 = vsel %vm183_vm0, %v2696_v23, 0.0  ;;  %1081 = vadd.xlane.f32.xlu2 %v1080_v49  ;;  %v1255_v17 = vpack.c.bf16 %v1134_v21, %v1134_v21  ;;  %v1192_v15 = vsel %vm183_vm0, %v1134_v21, 0.0 }
 0x31a   :  { %v1169_v39 = vrot.slane %v1168_v34, 1  ;;  %v1188_v60 = vrot.slane %v1187_v53, 2  ;;  %1934 = vpow2.f32 %v988_v59  ;;  %1057 = vadd.xlane.f32.xlu0 %v1056_v37 }
 0x31b   :  { %v1933_v57 = vpop.eup %1932  ;;  %v1449_v56 = vunpack.c.l.b16 %v1255_v17 }
 0x31c   :  { %v1170_v55 = vadd.f32 %v1169_v39, %v1168_v34  ;;  %v1189_v1 = vadd.f32 %v1188_v60, %v1187_v53  ;;  %v1135_v35 = vmul.f32 %v1933_v57, %v2549_v32 }
 0x31d   :  { %1802 = vmatmul.msk.bf16.gmra.mxu3 %vm183_vm0, %v1375_v20 }
 0x31e   :  { %1235 = vst.msk [vmem:[%s2922_s4] sm:$0x1] %vm1234_vm1, %v1170_v55  ;;  %v1190_v16 = vrot.slane %v1189_v1, 1  ;;  %v1193_v61 = vsel %vm183_vm0, %v1135_v35, 0.0  ;;  %v1256_v18 = vpack.c.bf16 %v1135_v35, %v1135_v35 }
 0x31f   :  { %v2711_v8 = vadd.f32 %v1193_v61, %v1192_v15 }
 0x320   :  { %v1191_v44 = vadd.f32 %v1190_v16, %v1189_v1  ;;  %v2713_v19 = vpop.eup %1934  ;;  %v1450_v32 = vunpack.c.l.b16 %v1256_v18 }
 0x321   :  { %v1083_v58 = vsel %vm183_vm0, %v2713_v19, 0.0 }
 0x322   :  { %1236 = vst.msk [vmem:[%s2922_s4 + $0x1] sm:$0x1] %vm1234_vm1, %v1191_v44  ;;  %v1457_v29 = vpack.c.b16 %v1450_v32, %v1449_v56  ;;  %1084 = vadd.xlane.f32.xlu0 %v1083_v58 }
 0x325   :  { %1803 = vmatmul.msk.bf16.vlgmr.msrb.gmra.mxu2 %vm183_vm0, %v1457_v29 }
 0x331   :  { %v1336_v7 = vpop.f32.mrf.mxu2 }
 0x332   :  { %1611 = vst.msk [vmem:[%s2923_s3] sm:$0xff] %vm183_vm0, %v1336_v7 }
 0x339   :  { %v1338_v43 = vpop.f32.mrf.mxu2 }
 0x33a   :  { %1612 = vst.msk [vmem:[%s2923_s3 + $0x8] sm:$0xff] %vm183_vm0, %v1338_v43 }
 0x341   :  { %v1341_v30 = vpop.f32.mrf.mxu2 }
 0x342   :  { %1613 = vst.msk [vmem:[%s2923_s3 + $0x10] sm:$0xff] %vm183_vm0, %v1341_v30 }
 0x349   :  { %v1343_v4 = vpop.f32.mrf.mxu2 }
 0x34a   :  { %1614 = vst.msk [vmem:[%s2923_s3 + $0x18] sm:$0xff] %vm183_vm0, %v1343_v4 }
 0x34c   :  { %v1064_v5 = vpop.xlane.xlu2 %1063 }
 0x354   :  { %v1049_v27 = vpop.xlane.xlu2 %1048 }
 0x355   :  { %1936 = vrcp.f32 %v1049_v27 }
 0x35b   :  { %v1937_v24 = vpop.eup %1936 }
 0x35c   :  { %v1046_v63 = vpop.xlane.xlu1 %1045  ;;  %v2739_v10 = vmul.f32 %v1937_v24, %v2590_v11 }
 0x35d   :  { %1938 = vrcp.f32 %v1046_v63 }
 0x35e   :  { %1940 = vrcp.f32 %v1064_v5  ;;  %v1258_v62 = vpack.c.bf16 %v2739_v10, %v2739_v10 }
 0x360   :  { %v1452_v51 = vunpack.c.l.b16 %v1258_v62 }
 0x363   :  { %v1939_v2 = vpop.eup %1938 }
 0x364   :  { %v2744_v28 = vmul.f32 %v1939_v2, %v2614_v46  ;;  %v1941_v47 = vpop.eup %1940 }
 0x365   :  { %v1067_v50 = vpop.xlane.xlu0 %1066  ;;  %v2749_v52 = vmul.f32 %v1941_v47, %v2583_v42 }
 0x366   :  { %1942 = vrcp.f32 %v1067_v50  ;;  %v1257_v45 = vpack.c.bf16 %v2744_v28, %v2744_v28  ;;  %v1195_v27 = vsel %vm183_vm0, %v2744_v28, 0.0 }
 0x367   :  { %v1421_v3 = vpop.f32.mrf.mxu3  ;;  %v1263_v12 = vpack.c.bf16 %v2749_v52, %v2749_v52 }
 0x368   :  { %1619 = vst.msk [vmem:[%s2923_s3 + $0x40] sm:$0xff] %vm183_vm0, %v1421_v3  ;;  %v1451_v11 = vunpack.c.l.b16 %v1257_v45  ;;  %v1213_v45 = vsel %vm183_vm0, %v2749_v52, 0.0  ;;  %v1197_v3 = vsel %vm183_vm0, %v2739_v10, 0.0 }
 0x369   :  { %v1534_v34 = vunpack.c.l.b16 %v1263_v12 }
 0x36a   :  { %v1458_v36 = vpack.c.b16 %v1452_v51, %v1451_v11 }
 0x36c   :  { %v1943_v46 = vpop.eup %1942  ;;  %v1073_v48 = vpop.xlane.xlu1 %1072  ;;  %1804 = vmatmul.msk.bf16.gmra.mxu2 %vm183_vm0, %v1458_v36 }
 0x36d   :  { %v2758_v41 = vmul.f32 %v1943_v46, %v2623_v22  ;;  %v1070_v42 = vpop.xlane.xlu0 %1069  ;;  %1944 = vrcp.f32 %v1073_v48 }
 0x36e   :  { %v1052_v54 = vpop.xlane.xlu2 %1051  ;;  %1946 = vrcp.f32 %v1070_v42 }
 0x36f   :  { %v1264_v33 = vpack.c.bf16 %v2758_v41, %v2758_v41  ;;  %v1423_v38 = vpop.f32.mrf.mxu3  ;;  %1948 = vrcp.f32 %v1052_v54 }
 0x370   :  { %v1346_v40 = vpop.f32.mrf.mxu2  ;;  %1620 = vst.msk [vmem:[%s2923_s3 + $0x48] sm:$0xff] %vm183_vm0, %v1423_v38 }
 0x371   :  { %v1535_v53 = vunpack.c.l.b16 %v1264_v33  ;;  %1615 = vst.msk [vmem:[%s2923_s3 + $0x20] sm:$0xff] %vm183_vm0, %v1346_v40 }
 0x373   :  { %v1542_v22 = vpack.c.b16 %v1535_v53, %v1534_v34  ;;  %v1945_v21 = vpop.eup %1944 }
 0x374   :  { %v1947_v49 = vpop.eup %1946  ;;  %v2773_v60 = vmul.f32 %v1945_v21, %v2636_v26 }
 0x375   :  { %1807 = vmatmul.msk.bf16.vlgmr.msrb.gmra.mxu3 %vm183_vm0, %v1542_v22  ;;  %v1055_v59 = vpop.xlane.xlu0 %1054  ;;  %v1949_v39 = vpop.eup %1948  ;;  %v1144_v37 = vmul.f32 %v1947_v49, %v2633_v31 }
 0x376   :  { %1950 = vrcp.f32 %v1055_v59  ;;  %v1138_v57 = vmul.f32 %v1949_v39, %v2639_v0  ;;  %v1266_v55 = vpack.c.bf16 %v2773_v60, %v2773_v60  ;;  %v1076_v17 = vpop.xlane.xlu1 %1075  ;;  %v1218_v38 = vsel %vm183_vm0, %v2773_v60, 0.0 }
 0x377   :  { %v1265_v1 = vpack.c.bf16 %v1144_v37, %v1144_v37  ;;  %v1216_v11 = vsel %vm183_vm0, %v1144_v37, 0.0 }
 0x378   :  { %v1348_v20 = vpop.f32.mrf.mxu2  ;;  %v1259_v16 = vpack.c.bf16 %v1138_v57, %v1138_v57  ;;  %v1537_v61 = vunpack.c.l.b16 %v1266_v55 }
 0x379   :  { %1616 = vst.msk [vmem:[%s2923_s3 + $0x28] sm:$0xff] %vm183_vm0, %v1348_v20  ;;  %v1536_v31 = vunpack.c.l.b16 %v1265_v1 }
 0x37a   :  { %v1453_v0 = vunpack.c.l.b16 %v1259_v16 }
 0x37b   :  { %v1543_v32 = vpack.c.b16 %v1537_v61, %v1536_v31 }
 0x37c   :  { %v1951_v35 = vpop.eup %1950 }
 0x37d   :  { %v1139_v26 = vmul.f32 %v1951_v35, %v2647_v13 }
 0x37e   :  { %v1079_v15 = vpop.xlane.xlu2 %1078  ;;  %v1061_v7 = vpop.xlane.xlu1 %1060 }
 0x37f   :  { %1952 = vrcp.f32 %v1079_v15  ;;  %v1260_v18 = vpack.c.bf16 %v1139_v26, %v1139_v26  ;;  %v1201_v52 = vsel %vm183_vm0, %v1139_v26, 0.0 }
 0x380   :  { %1954 = vrcp.f32 %v1076_v17  ;;  %v1426_v44 = vpop.f32.mrf.mxu3 }
 0x381   :  { %1621 = vst.msk [vmem:[%s2923_s3 + $0x50] sm:$0xff] %vm183_vm0, %v1426_v44  ;;  %v1454_v56 = vunpack.c.l.b16 %v1260_v18  ;;  %1956 = vrcp.f32 %v1061_v7 }
 0x383   :  { %v1459_v58 = vpack.c.b16 %v1454_v56, %v1453_v0 }
 0x385   :  { %v1953_v29 = vpop.eup %1952  ;;  %1808 = vmatmul.msk.bf16.gmra.mxu3 %vm183_vm0, %v1543_v32  ;;  %1805 = vmatmul.msk.bf16.gmra.mxu2 %vm183_vm0, %v1459_v58 }
 0x386   :  { %v1955_v13 = vpop.eup %1954  ;;  %v1147_v43 = vmul.f32 %v1953_v29, %v2670_v6  ;;  %v1196_v6 = vadd.f32 %v1195_v27, %v2711_v8  ;;  %v1199_v8 = vsel %vm183_vm0, %v1138_v57, 0.0 }
 0x387   :  { %v1146_v4 = vmul.f32 %v1955_v13, %v2651_v25  ;;  %v1957_v62 = vpop.eup %1956  ;;  %v1214_v25 = vsel %vm183_vm0, %v2758_v41, 0.0 }
 0x388   :  { %v1428_v30 = vpop.f32.mrf.mxu3  ;;  %v1268_v5 = vpack.c.bf16 %v1147_v43, %v1147_v43  ;;  %v1141_v51 = vmul.f32 %v1957_v62, %v2666_v9  ;;  %v1215_v36 = vadd.f32 %v1214_v25, %v1213_v45  ;;  %v1198_v46 = vadd.f32 %v1197_v3, %v1196_v6 }
 0x389   :  { %1622 = vst.msk [vmem:[%s2923_s3 + $0x58] sm:$0xff] %vm183_vm0, %v1428_v30  ;;  %v1267_v63 = vpack.c.bf16 %v1146_v4, %v1146_v4  ;;  %v1220_v9 = vsel %vm183_vm0, %v1146_v4, 0.0  ;;  %v1222_v20 = vsel %vm183_vm0, %v1147_v43, 0.0 }
 0x38a   :  { %v1539_v50 = vunpack.c.l.b16 %v1268_v5  ;;  %v1200_v42 = vadd.f32 %v1199_v8, %v1198_v46  ;;  %v1217_v54 = vadd.f32 %v1216_v11, %v1215_v36  ;;  %v1262_v33 = vpack.c.bf16 %v1141_v51, %v1141_v51 }
 0x38b   :  { %v1538_v28 = vunpack.c.l.b16 %v1267_v63 }
 0x38c   :  { %v1082_v24 = vpop.xlane.xlu2 %1081  ;;  %v1202_v34 = vadd.f32 %v1201_v52, %v1200_v42  ;;  %v1219_v39 = vadd.f32 %v1218_v38, %v1217_v54  ;;  %v1456_v60 = vunpack.c.l.b16 %v1262_v33 }
 0x38d   :  { %1958 = vrcp.f32 %v1082_v24  ;;  %v1058_v2 = vpop.xlane.xlu0 %1057  ;;  %v1544_v12 = vpack.c.b16 %v1539_v50, %v1538_v28 }
 0x38e   :  { %1960 = vrcp.f32 %v1058_v2  ;;  %v1221_v57 = vadd.f32 %v1220_v9, %v1219_v39 }
 0x390   :  { %v1431_v47 = vpop.f32.mrf.mxu3  ;;  %v1223_v16 = vadd.f32 %v1222_v20, %v1221_v57 }
 0x391   :  { %1623 = vst.msk [vmem:[%s2923_s3 + $0x60] sm:$0xff] %vm183_vm0, %v1431_v47 }
 0x393   :  { %v1959_v41 = vpop.eup %1958 }
 0x394   :  { %v1961_v48 = vpop.eup %1960  ;;  %v1148_v53 = vmul.f32 %v1959_v41, %v2694_v14 }
 0x395   :  { %1809 = vmatmul.msk.bf16.gmra.mxu3 %vm183_vm0, %v1544_v12  ;;  %v1140_v10 = vmul.f32 %v1961_v48, %v2696_v23  ;;  %v1085_v40 = vpop.xlane.xlu0 %1084  ;;  %v1205_v23 = vsel %vm183_vm0, %v1141_v51, 0.0 }
 0x396   :  { %1962 = vrcp.f32 %v1085_v40  ;;  %v1224_v1 = vsel %vm183_vm0, %v1148_v53, 0.0  ;;  %v1269_v15 = vpack.c.bf16 %v1148_v53, %v1148_v53 }
 0x397   :  { %v1203_v22 = vsel %vm183_vm0, %v1140_v10, 0.0  ;;  %v1261_v21 = vpack.c.bf16 %v1140_v10, %v1140_v10  ;;  %v1225_v61 = vadd.f32 %v1224_v1, %v1223_v16 }
 0x398   :  { %v1351_v59 = vpop.f32.mrf.mxu2  ;;  %v1433_v49 = vpop.f32.mrf.mxu3  ;;  %v1204_v37 = vadd.f32 %v1203_v22, %v1202_v34  ;;  %v1540_v13 = vunpack.c.l.b16 %v1269_v15 }
 0x399   :  { %1617 = vst.msk [vmem:[%s2923_s3 + $0x30] sm:$0xff] %vm183_vm0, %v1351_v59  ;;  %v1455_v14 = vunpack.c.l.b16 %v1261_v21 }
 0x39a   :  { %1624 = vst.msk [vmem:[%s2923_s3 + $0x68] sm:$0xff] %vm183_vm0, %v1433_v49  ;;  %v1206_v55 = vadd.f32 %v1205_v23, %v1204_v37 }
 0x39b   :  { %v1460_v17 = vpack.c.b16 %v1456_v60, %v1455_v14 }
 0x39c   :  { %v1963_v35 = vpop.eup %1962  ;;  %v1207_v26 = vrot.slane %v1206_v55, 4 }
 0x39d   :  { %v1149_v31 = vmul.f32 %v1963_v35, %v2713_v19  ;;  %1806 = vmatmul.msk.bf16.gmra.mxu2 %vm183_vm0, %v1460_v17 }
 0x39e   :  { %v1208_v18 = vadd.f32 %v1207_v26, %v1206_v55 }
 0x39f   :  { %v1226_v44 = vsel %vm183_vm0, %v1149_v31, 0.0  ;;  %v1270_v0 = vpack.c.bf16 %v1149_v31, %v1149_v31 }
 0x3a0   :  { %v1353_v56 = vpop.f32.mrf.mxu2  ;;  %v1436_v32 = vpop.f32.mrf.mxu3  ;;  %v1209_v58 = vrot.slane %v1208_v18, 2  ;;  %v1227_v29 = vadd.f32 %v1226_v44, %v1225_v61 }
 0x3a1   :  { %1618 = vst.msk [vmem:[%s2923_s3 + $0x38] sm:$0xff] %vm183_vm0, %v1353_v56  ;;  %v1541_v7 = vunpack.c.l.b16 %v1270_v0 }
 0x3a2   :  { %1625 = vst.msk [vmem:[%s2923_s3 + $0x70] sm:$0xff] %vm183_vm0, %v1436_v32  ;;  %v1210_v19 = vadd.f32 %v1209_v58, %v1208_v18  ;;  %v1228_v43 = vrot.slane %v1227_v29, 4 }
 0x3a3   :  { %v1545_v30 = vpack.c.b16 %v1541_v7, %v1540_v13 }
 0x3a4   :  { %v1211_v4 = vrot.slane %v1210_v19, 1  ;;  %v1229_v5 = vadd.f32 %v1228_v43, %v1227_v29 }
 0x3a5   :  { %1810 = vmatmul.msk.bf16.gmra.mxu3 %vm183_vm0, %v1545_v30 }
 0x3a6   :  { %v1212_v27 = vadd.f32 %v1211_v4, %v1210_v19  ;;  %v1230_v63 = vrot.slane %v1229_v5, 2 }
 0x3a8   :  { %v1438_v24 = vpop.f32.mrf.mxu3  ;;  %v1506_v2 = vpop.f32.mrf.mxu2  ;;  %1237 = vst.msk [vmem:[%s2922_s4 + $0x2] sm:$0x1] %vm1234_vm1, %v1212_v27  ;;  %v1231_v62 = vadd.f32 %v1230_v63, %v1229_v5 }
 0x3a9   :  { %1626 = vst.msk [vmem:[%s2923_s3 + $0x78] sm:$0xff] %vm183_vm0, %v1438_v24 }
 0x3aa   :  { %v1232_v6 = vrot.slane %v1231_v62, 1  ;;  %1627 = vst.msk [vmem:[%s2923_s3 + $0x80] sm:$0xff] %vm183_vm0, %v1506_v2 }
 0x3ac   :  { %v1233_v50 = vadd.f32 %v1232_v6, %v1231_v62 }
 0x3ae   :  { %1238 = vst.msk [vmem:[%s2922_s4 + $0x3] sm:$0x1] %vm1234_vm1, %v1233_v50 }
 0x3b0   :  { %v1508_v25 = vpop.f32.mrf.mxu2 }
 0x3b1   :  { %1628 = vst.msk [vmem:[%s2923_s3 + $0x88] sm:$0xff] %vm183_vm0, %v1508_v25 }
 0x3ef   :  { %v1511_v47 = vpop.f32.mrf.mxu2 }
 0x3f0   :  { %1629 = vst.msk [vmem:[%s2923_s3 + $0x90] sm:$0xff] %vm183_vm0, %v1511_v47 }
 0x3f7   :  { %v1513_v45 = vpop.f32.mrf.mxu2 }
 0x3f8   :  { %v1591_v28 = vpop.f32.mrf.mxu3  ;;  %1630 = vst.msk [vmem:[%s2923_s3 + $0x98] sm:$0xff] %vm183_vm0, %v1513_v45 }
 0x3f9   :  { %1635 = vst.msk [vmem:[%s2923_s3 + $0xc0] sm:$0xff] %vm183_vm0, %v1591_v28 }
 0x400   :  { %v1593_v3 = vpop.f32.mrf.mxu3 }
 0x401   :  { %1636 = vst.msk [vmem:[%s2923_s3 + $0xc8] sm:$0xff] %vm183_vm0, %v1593_v3 }
 0x408   :  { %v1596_v8 = vpop.f32.mrf.mxu3  ;;  %v1516_v11 = vpop.f32.mrf.mxu2 }
 0x409   :  { %1637 = vst.msk [vmem:[%s2923_s3 + $0xd0] sm:$0xff] %vm183_vm0, %v1596_v8 }
 0x40a   :  { %1631 = vst.msk [vmem:[%s2923_s3 + $0xa0] sm:$0xff] %vm183_vm0, %v1516_v11 }
 0x410   :  { %v1598_v51 = vpop.f32.mrf.mxu3  ;;  %v1518_v36 = vpop.f32.mrf.mxu2 }
 0x411   :  { %1638 = vst.msk [vmem:[%s2923_s3 + $0xd8] sm:$0xff] %vm183_vm0, %v1598_v51 }
 0x412   :  { %1632 = vst.msk [vmem:[%s2923_s3 + $0xa8] sm:$0xff] %vm183_vm0, %v1518_v36 }
 0x418   :  { %v1601_v46 = vpop.f32.mrf.mxu3 }
 0x419   :  { %1639 = vst.msk [vmem:[%s2923_s3 + $0xe0] sm:$0xff] %vm183_vm0, %v1601_v46 }
 0x420   :  { %v1603_v12 = vpop.f32.mrf.mxu3  ;;  %v1521_v41 = vpop.f32.mrf.mxu2 }
 0x421   :  { %1640 = vst.msk [vmem:[%s2923_s3 + $0xe8] sm:$0xff] %vm183_vm0, %v1603_v12 }
 0x422   :  { %1633 = vst.msk [vmem:[%s2923_s3 + $0xb0] sm:$0xff] %vm183_vm0, %v1521_v41 }
 0x428   :  { %v1523_v52 = vpop.f32.mrf.mxu2  ;;  %v1606_v48 = vpop.f32.mrf.mxu3 }
 0x429   :  { %1634 = vst.msk [vmem:[%s2923_s3 + $0xb8] sm:$0xff] %vm183_vm0, %v1523_v52 }
 0x42a   :  { %1641 = vst.msk [vmem:[%s2923_s3 + $0xf0] sm:$0xff] %vm183_vm0, %v1606_v48 }
 0x430   :  { %v1608_v42 = vpop.f32.mrf.mxu3 }
 0x431   :  { %1642 = vst.msk [vmem:[%s2923_s3 + $0xf8] sm:$0xff] %vm183_vm0, %v1608_v42 }

</bundles_post_ra>
